<compile_context>
chip_gen: v7x
topology: tpu7x:2x2x1
jax: 0.10.0
libtpu: 0.0.40
codegen_flags: <defaults>
</compile_context>

<pallas_src>
import functools

import jax
import jax.numpy as jnp
from jax import lax
from jax.experimental import pallas as pl
from jax.experimental.pallas import tpu as pltpu


def _conv_bn_relu_kernel(x_ref, w_ref, sc_ref, bs_ref, o_ref, *,
                         KH, KW, stride, dilation, TH, Wo):
    """Fused conv + folded BN + ReLU for one (batch, row-tile, cout-tile) grid step.

    x_ref : (1, Hp, Wp, Cin)    full zero-padded NHWC input for batch n
                                (same block across r/c -> DMA'd once per batch)
    w_ref : (KH*KW*Cin, TCout)  im2col-ordered weight slab for this Cout tile
    sc_ref: (1, TCout)          folded BN scale   gamma / sqrt(var + eps)
    bs_ref: (1, TCout)          folded BN bias    beta - mean * scale
    o_ref : (1, TH, Wo, TCout)  output row / cout tile
    """
    cin = x_ref.shape[-1]
    tcout = o_ref.shape[-1]

    r = pl.program_id(1)
    row0 = pl.multiple_of(r * (TH * stride), TH * stride)
    h_span = (TH - 1) * stride + 1
    w_span = (Wo - 1) * stride + 1

    # Slice each tap directly from the ref (bounded vreg pressure) and build the
    # im2col LHS (TH*Wo, KH*KW*Cin) -> a single MXU matmul.
    taps = []
    for kh in range(KH):
        for kw in range(KW):
            tap = x_ref[0,
                        pl.ds(row0 + kh * dilation, h_span),
                        pl.ds(kw * dilation, w_span),
                        :]                                    # (h_span, w_span, Cin)
            if stride > 1:
                tap = lax.slice(tap, (0, 0, 0), tap.shape, (stride, stride, 1))
            taps.append(tap)                                  # (TH, Wo, Cin)

    lhs = jnp.concatenate(taps, axis=-1).reshape(TH * Wo, KH * KW * cin)
    acc = jnp.dot(lhs, w_ref[...], preferred_element_type=jnp.float32)

    # Folded BatchNorm (eval mode) + ReLU, in f32, on a lane-dense Cout tile.
    y = jnp.maximum(acc * sc_ref[...] + bs_ref[...], 0.0)
    o_ref[...] = y.reshape(1, TH, Wo, tcout).astype(o_ref.dtype)


def _pick_row_tile(Ho, Wo, target_rows=512):
    """Largest divisor of Ho with roughly target_rows output pixels per tile."""
    th = max(1, min(Ho, max(1, target_rows // max(1, Wo))))
    while Ho % th:
        th -= 1
    return th


def basic_conv2d(x_nchw, weight_oihw, gamma, beta, running_mean, running_var,
                 *, kernel_size, padding=0, stride=1, dilation=1, eps=1e-3):
    """Pallas implementation of BasicConv2d.forward (NCHW in / NCHW out)."""
    # Reproduce BasicConv2d.__init__'s padding override for dilation == 2.
    if dilation == 2:
        padding = {1: 0, 3: 2, 5: 4}.get(kernel_size, padding)

    N, Cin, H, W = x_nchw.shape
    Cout = weight_oihw.shape[0]
    KH = KW = kernel_size

    # NCHW -> NHWC and explicit zero padding (glue; see TODO above).
    x = jnp.transpose(x_nchw, (0, 2, 3, 1))
    x = jnp.pad(x, ((0, 0), (padding, padding), (padding, padding), (0, 0)))
    Hp, Wp = H + 2 * padding, W + 2 * padding
    Ho = (Hp - dilation * (KH - 1) - 1) // stride + 1
    Wo = (Wp - dilation * (KW - 1) - 1) // stride + 1

    # im2col weight: OIHW -> (KH, KW, Cin, Cout) -> (KH*KW*Cin, Cout), then pad
    # Cout up to a lane-dense multiple of 128.
    TCOUT = 128
    Cout_p = ((Cout + TCOUT - 1) // TCOUT) * TCOUT
    w = jnp.transpose(weight_oihw, (2, 3, 1, 0)).reshape(KH * KW * Cin, Cout)
    w = jnp.pad(w, ((0, 0), (0, Cout_p - Cout))).astype(x.dtype)

    # Fold BatchNorm (eval mode) into per-channel scale / bias (f32), padded.
    scale = (gamma / jnp.sqrt(running_var + eps)).astype(jnp.float32)
    bias = (beta - running_mean * scale).astype(jnp.float32)
    scale = jnp.pad(scale, (0, Cout_p - Cout)).reshape(1, Cout_p)
    bias = jnp.pad(bias, (0, Cout_p - Cout)).reshape(1, Cout_p)

    TH = _pick_row_tile(Ho, Wo)
    grid = (N, Ho // TH, Cout_p // TCOUT)

    kernel = functools.partial(_conv_bn_relu_kernel, KH=KH, KW=KW,
                               stride=stride, dilation=dilation, TH=TH, Wo=Wo)

    out_nhwc = pl.pallas_call(
        kernel,
        out_shape=jax.ShapeDtypeStruct((N, Ho, Wo, Cout_p), x_nchw.dtype),
        grid_spec=pltpu.PrefetchScalarGridSpec(
            num_scalar_prefetch=0,
            grid=grid,
            in_specs=[
                # Full padded image per batch; block index constant across r/c.
                pl.BlockSpec((1, Hp, Wp, Cin), lambda n, r, c: (n, 0, 0, 0)),
                pl.BlockSpec((KH * KW * Cin, TCOUT), lambda n, r, c: (0, c)),
                pl.BlockSpec((1, TCOUT), lambda n, r, c: (0, c)),
                pl.BlockSpec((1, TCOUT), lambda n, r, c: (0, c)),
            ],
            out_specs=pl.BlockSpec((1, TH, Wo, TCOUT),
                                   lambda n, r, c: (n, r, 0, c)),
        ),
        compiler_params=pltpu.CompilerParams(
            dimension_semantics=("parallel", "parallel", "parallel"),
            vmem_limit_bytes=48 * 1024 * 1024),
    )(x, w, scale, bias)

    # Drop Cout padding, NHWC -> NCHW.
    return jnp.transpose(out_nhwc[..., :Cout], (0, 3, 1, 2))


def _reference(x_nchw, weight_oihw, gamma, beta, running_mean, running_var,
               *, kernel_size, padding=0, stride=1, dilation=1, eps=1e-3):
    """Pure-JAX reference for correctness checking."""
    if dilation == 2:
        padding = {1: 0, 3: 2, 5: 4}.get(kernel_size, padding)
    y = lax.conv_general_dilated(
        x_nchw, weight_oihw,
        window_strides=(stride, stride),
        padding=((padding, padding), (padding, padding)),
        rhs_dilation=(dilation, dilation),
        dimension_numbers=("NCHW", "OIHW", "NCHW"))
    scale = gamma / jnp.sqrt(running_var + eps)
    bias = beta - running_mean * scale
    y = y * scale[None, :, None, None] + bias[None, :, None, None]
    return jnp.maximum(y, 0.0)


if __name__ == "__main__":
    key = jax.random.PRNGKey(0)
    k1, k2, k3, k4, k5, k6 = jax.random.split(key, 6)

    # Small shapes consistent with BasicConv2d(in=4, out=8, kernel_size=3, padding=1)
    N, Cin, H, W = 2, 4, 16, 16
    Cout, ksize, pad = 8, 3, 1

    x = jax.random.normal(k1, (N, Cin, H, W), jnp.float32)
    weight = jax.random.normal(k2, (Cout, Cin, ksize, ksize), jnp.float32) * 0.1
    gamma = 1.0 + 0.1 * jax.random.normal(k3, (Cout,), jnp.float32)
    beta = 0.1 * jax.random.normal(k4, (Cout,), jnp.float32)
    running_mean = 0.1 * jax.random.normal(k5, (Cout,), jnp.float32)
    running_var = jax.random.uniform(k6, (Cout,), jnp.float32, minval=0.5, maxval=1.5)

    # Case 1: kernel_size=3, padding=1, stride=1, dilation=1.
    out = basic_conv2d(x, weight, gamma, beta, running_mean, running_var,
                       kernel_size=ksize, padding=pad)
    out = jax.block_until_ready(out)
    ref = _reference(x, weight, gamma, beta, running_mean, running_var,
                     kernel_size=ksize, padding=pad)
    assert out.shape == (N, Cout, H, W), out.shape
    assert jnp.allclose(out, ref, atol=1e-4, rtol=1e-4), \
        float(jnp.max(jnp.abs(out - ref)))

    # Case 2: dilation=2 exercises the module's padding-override branch.
    out2 = basic_conv2d(x, weight, gamma, beta, running_mean, running_var,
                        kernel_size=ksize, padding=pad, dilation=2)
    out2 = jax.block_until_ready(out2)
    ref2 = _reference(x, weight, gamma, beta, running_mean, running_var,
                      kernel_size=ksize, padding=pad, dilation=2)
    assert out2.shape == ref2.shape, (out2.shape, ref2.shape)
    assert jnp.allclose(out2, ref2, atol=1e-4, rtol=1e-4), \
        float(jnp.max(jnp.abs(out2 - ref2)))

    print("KERNEL_OK")
</pallas_src>

<mosaic_0001>
module attributes {stable_mosaic.version = 11 : i64} {
  func.func @_conv_bn_relu_kernel(%arg0: i32, %arg1: i32, %arg2: i32, %arg3: memref<1x18x18x4xf32, #tpu.memory_space<vmem>>, %arg4: memref<36x128xf32, #tpu.memory_space<vmem>>, %arg5: memref<1x128xf32, #tpu.memory_space<vmem>>, %arg6: memref<1x128xf32, #tpu.memory_space<vmem>>, %arg7: memref<1x16x16x128xf32, #tpu.memory_space<vmem>>) attributes {dimension_semantics = [#tpu.dimension_semantics<parallel>, #tpu.dimension_semantics<parallel>, #tpu.dimension_semantics<parallel>], iteration_bounds = array<i64: 2, 1, 1>, scalar_prefetch = 0 : i64, scratch_operands = 0 : i64, tpu.core_type = #tpu.core_type<tc>, window_params = [{transform_indices = @transform_0, window_bounds = array<i64: 1, 18, 18, 4>}, {transform_indices = @transform_1, window_bounds = array<i64: 36, 128>}, {transform_indices = @transform_2, window_bounds = array<i64: 1, 128>}, {transform_indices = @transform_3, window_bounds = array<i64: 1, 128>}, {transform_indices = @transform_4, window_bounds = array<i64: 1, 16, 16, 128>}]} {
    %c16_i32 = arith.constant 16 : i32
    %0 = arith.muli %arg1, %c16_i32 : i32
    %1 = tpu.assume_multiple %0, 16 : i32
    %c0_i32 = arith.constant 0 : i32
    %2 = arith.addi %1, %c0_i32 : i32
    %c0 = arith.constant 0 : index
    %3 = arith.index_cast %2 : i32 to index
    %c0_0 = arith.constant 0 : index
    %c0_1 = arith.constant 0 : index
    %4 = vector.load %arg3[%c0, %3, %c0_0, %c0_1] : memref<1x18x18x4xf32, #tpu.memory_space<vmem>>, vector<1x16x16x4xf32>
    %5 = vector.shape_cast %4 : vector<1x16x16x4xf32> to vector<16x16x4xf32>
    %c0_i32_2 = arith.constant 0 : i32
    %6 = arith.addi %1, %c0_i32_2 : i32
    %c0_3 = arith.constant 0 : index
    %7 = arith.index_cast %6 : i32 to index
    %c1 = arith.constant 1 : index
    %c0_4 = arith.constant 0 : index
    %8 = vector.load %arg3[%c0_3, %7, %c1, %c0_4] : memref<1x18x18x4xf32, #tpu.memory_space<vmem>>, vector<1x16x16x4xf32>
    %9 = vector.shape_cast %8 : vector<1x16x16x4xf32> to vector<16x16x4xf32>
    %c0_i32_5 = arith.constant 0 : i32
    %10 = arith.addi %1, %c0_i32_5 : i32
    %c0_6 = arith.constant 0 : index
    %11 = arith.index_cast %10 : i32 to index
    %c2 = arith.constant 2 : index
    %c0_7 = arith.constant 0 : index
    %12 = vector.load %arg3[%c0_6, %11, %c2, %c0_7] : memref<1x18x18x4xf32, #tpu.memory_space<vmem>>, vector<1x16x16x4xf32>
    %13 = vector.shape_cast %12 : vector<1x16x16x4xf32> to vector<16x16x4xf32>
    %c1_i32 = arith.constant 1 : i32
    %14 = arith.addi %1, %c1_i32 : i32
    %c0_8 = arith.constant 0 : index
    %15 = arith.index_cast %14 : i32 to index
    %c0_9 = arith.constant 0 : index
    %c0_10 = arith.constant 0 : index
    %16 = vector.load %arg3[%c0_8, %15, %c0_9, %c0_10] : memref<1x18x18x4xf32, #tpu.memory_space<vmem>>, vector<1x16x16x4xf32>
    %17 = vector.shape_cast %16 : vector<1x16x16x4xf32> to vector<16x16x4xf32>
    %c1_i32_11 = arith.constant 1 : i32
    %18 = arith.addi %1, %c1_i32_11 : i32
    %c0_12 = arith.constant 0 : index
    %19 = arith.index_cast %18 : i32 to index
    %c1_13 = arith.constant 1 : index
    %c0_14 = arith.constant 0 : index
    %20 = vector.load %arg3[%c0_12, %19, %c1_13, %c0_14] : memref<1x18x18x4xf32, #tpu.memory_space<vmem>>, vector<1x16x16x4xf32>
    %21 = vector.shape_cast %20 : vector<1x16x16x4xf32> to vector<16x16x4xf32>
    %c1_i32_15 = arith.constant 1 : i32
    %22 = arith.addi %1, %c1_i32_15 : i32
    %c0_16 = arith.constant 0 : index
    %23 = arith.index_cast %22 : i32 to index
    %c2_17 = arith.constant 2 : index
    %c0_18 = arith.constant 0 : index
    %24 = vector.load %arg3[%c0_16, %23, %c2_17, %c0_18] : memref<1x18x18x4xf32, #tpu.memory_space<vmem>>, vector<1x16x16x4xf32>
    %25 = vector.shape_cast %24 : vector<1x16x16x4xf32> to vector<16x16x4xf32>
    %c2_i32 = arith.constant 2 : i32
    %26 = arith.addi %1, %c2_i32 : i32
    %c0_19 = arith.constant 0 : index
    %27 = arith.index_cast %26 : i32 to index
    %c0_20 = arith.constant 0 : index
    %c0_21 = arith.constant 0 : index
    %28 = vector.load %arg3[%c0_19, %27, %c0_20, %c0_21] : memref<1x18x18x4xf32, #tpu.memory_space<vmem>>, vector<1x16x16x4xf32>
    %29 = vector.shape_cast %28 : vector<1x16x16x4xf32> to vector<16x16x4xf32>
    %c2_i32_22 = arith.constant 2 : i32
    %30 = arith.addi %1, %c2_i32_22 : i32
    %c0_23 = arith.constant 0 : index
    %31 = arith.index_cast %30 : i32 to index
    %c1_24 = arith.constant 1 : index
    %c0_25 = arith.constant 0 : index
    %32 = vector.load %arg3[%c0_23, %31, %c1_24, %c0_25] : memref<1x18x18x4xf32, #tpu.memory_space<vmem>>, vector<1x16x16x4xf32>
    %33 = vector.shape_cast %32 : vector<1x16x16x4xf32> to vector<16x16x4xf32>
    %c2_i32_26 = arith.constant 2 : i32
    %34 = arith.addi %1, %c2_i32_26 : i32
    %c0_27 = arith.constant 0 : index
    %35 = arith.index_cast %34 : i32 to index
    %c2_28 = arith.constant 2 : index
    %c0_29 = arith.constant 0 : index
    %36 = vector.load %arg3[%c0_27, %35, %c2_28, %c0_29] : memref<1x18x18x4xf32, #tpu.memory_space<vmem>>, vector<1x16x16x4xf32>
    %37 = vector.shape_cast %36 : vector<1x16x16x4xf32> to vector<16x16x4xf32>
    %38 = tpu.concatenate %5, %9, %13, %17, %21, %25, %29, %33, %37 in 2 : vector<16x16x4xf32>, vector<16x16x4xf32>, vector<16x16x4xf32>, vector<16x16x4xf32>, vector<16x16x4xf32>, vector<16x16x4xf32>, vector<16x16x4xf32>, vector<16x16x4xf32>, vector<16x16x4xf32> -> vector<16x16x36xf32>
    %39 = vector.shape_cast %38 : vector<16x16x36xf32> to vector<256x36xf32>
    %c0_30 = arith.constant 0 : index
    %c0_31 = arith.constant 0 : index
    %40 = vector.load %arg4[%c0_30, %c0_31] : memref<36x128xf32, #tpu.memory_space<vmem>>, vector<36x128xf32>
    %cst = arith.constant dense<0.000000e+00> : vector<256x128xf32>
    %41 = tpu.matmul %39, %40, %cst {dimension_numbers = #tpu.dot_dimension_numbers<[1], [0], [0], [1], [0, 0, 1, 1], [], []>} : vector<256x36xf32>, vector<36x128xf32>, vector<256x128xf32> -> vector<256x128xf32>
    %c0_32 = arith.constant 0 : index
    %c0_33 = arith.constant 0 : index
    %42 = vector.load %arg5[%c0_32, %c0_33] : memref<1x128xf32, #tpu.memory_space<vmem>>, vector<1x128xf32>
    %43 = vector.broadcast %42 : vector<1x128xf32> to vector<256x128xf32>
    %44 = arith.mulf %41, %43 : vector<256x128xf32>
    %c0_34 = arith.constant 0 : index
    %c0_35 = arith.constant 0 : index
    %45 = vector.load %arg6[%c0_34, %c0_35] : memref<1x128xf32, #tpu.memory_space<vmem>>, vector<1x128xf32>
    %46 = vector.broadcast %45 : vector<1x128xf32> to vector<256x128xf32>
    %47 = arith.addf %44, %46 : vector<256x128xf32>
    %cst_36 = arith.constant 0.000000e+00 : f32
    %48 = vector.broadcast %cst_36 : f32 to vector<256x128xf32>
    %49 = arith.maximumf %47, %48 : vector<256x128xf32>
    %50 = vector.shape_cast %49 : vector<256x128xf32> to vector<1x16x16x128xf32>
    %c0_37 = arith.constant 0 : index
    %c0_38 = arith.constant 0 : index
    %c0_39 = arith.constant 0 : index
    %c0_40 = arith.constant 0 : index
    %51 = vector.load %arg7[%c0_37, %c0_38, %c0_39, %c0_40] : memref<1x16x16x128xf32, #tpu.memory_space<vmem>>, vector<1x16x16x128xf32>
    tpu.vector_store %arg7[%c0_37, %c0_38, %c0_39, %c0_40], %50 {strides = array<i32>} : memref<1x16x16x128xf32, #tpu.memory_space<vmem>>, vector<1x16x16x128xf32>,
    return
  }
  func.func @transform_0(%arg0: i32, %arg1: i32, %arg2: i32) -> (i32, i32, i32, i32) {
    %c0_i32 = arith.constant 0 : i32
    %c0_i32_0 = arith.constant 0 : i32
    %c0_i32_1 = arith.constant 0 : i32
    %c0_i32_2 = arith.constant 0 : i32
    return %arg0, %c0_i32, %c0_i32_0, %c0_i32_1 : i32, i32, i32, i32
  }
  func.func @transform_1(%arg0: i32, %arg1: i32, %arg2: i32) -> (i32, i32) {
    %c0_i32 = arith.constant 0 : i32
    %c0_i32_0 = arith.constant 0 : i32
    return %c0_i32, %arg2 : i32, i32
  }
  func.func @transform_2(%arg0: i32, %arg1: i32, %arg2: i32) -> (i32, i32) {
    %c0_i32 = arith.constant 0 : i32
    %c0_i32_0 = arith.constant 0 : i32
    return %c0_i32, %arg2 : i32, i32
  }
  func.func @transform_3(%arg0: i32, %arg1: i32, %arg2: i32) -> (i32, i32) {
    %c0_i32 = arith.constant 0 : i32
    %c0_i32_0 = arith.constant 0 : i32
    return %c0_i32, %arg2 : i32, i32
  }
  func.func @transform_4(%arg0: i32, %arg1: i32, %arg2: i32) -> (i32, i32, i32, i32) {
    %c0_i32 = arith.constant 0 : i32
    %c0_i32_0 = arith.constant 0 : i32
    return %arg0, %arg1, %c0_i32, %arg2 : i32, i32, i32, i32
  }
}

</mosaic_0001>

<bundles_post_ra>
// kernel: tpu_custom_call.1
= control target key start
LH: loop header
LB: loop body
LE: loop exit
PB: predicated region body
PF: predicated region fallthrough
CT: control target
= control target key end

     0   :  { %9 = vsyncpa [#allocation3], 0  ;;  %s4601_s0 = inlined_call_operand.vmem [shape: f32[2,18,18,4], index: 0, kind: input, shape index: {}]   ;;  %s4602_s1 = inlined_call_operand.vmem [shape: f32[36,128], index: 1, kind: input, shape index: {}]   ;;  %s4603_s2 = inlined_call_operand.vmem [shape: f32[1,128], index: 2, kind: input, shape index: {}]   ;;  %s4604_s3 = inlined_call_operand.vmem [shape: f32[1,128], index: 3, kind: input, shape index: {}]   ;;  %s4605_s4 = inlined_call_operand.hbm [shape: f32[2,16,16,128], index: 4, kind: output, shape index: {}]  }
   0x1   :  { %11 = vsyncpa [#allocation3 + $0x1], 0  ;;  %s2999_s15 = smov 0   ;;  %s3001_s16 = smov 0  }
   0x2   :  { %s3003_s17 = smov 0   ;;  %s3005_s18 = smov 0  }
   0x3   :  { %s3007_s19 = smov 0   ;;  %s3009_s20 = smov 0  }
   0x4 LB: > { %s2467_s21 = sadd.s32 4294967295, %s2962_s20   ;;  %s2468_s22 = sadd.s32 4294967294, %s2962_s20   ;;  %s2962_s20 = sphi %s3009_s20, %s17_s20   ;;  %s2958_s19 = sphi %s3007_s19, %s4737_s19   ;;  %s2954_s18 = sphi %s3005_s18, %s4736_s18   ;;  %s2950_s17 = sphi %s3003_s17, %s4735_s17   ;;  %s2946_s16 = sphi %s3001_s16, %s4734_s16   ;;  %s2942_s15 = sphi %s2999_s15, %s4733_s15  }
   0x5   : > { %s36_s23 = sadd.s32 1, %s2958_s19  ;;  %s151_s24 = sadd.s32 1, %s2950_s17 }
   0x6   : > { %p38_p0 = scmp.ge.s32.totalorder %s36_s23, 2  ;;  %p161_p1 = scmp.ne.s32.totalorder %s2950_s17, %s2946_s16 }
   0x7   : > { %p162_p2 = scmp.eq.s32.totalorder %s2467_s21, 1  ;;  %p167_p3 = scmp.ne.s32.totalorder %s2946_s16, %s2942_s15 }
   0x8   : > { %s4739_s23 = smov (%p38_p0, %s36_s23), 0  ;;  %p168_p5 = scmp.eq.s32.totalorder %s2468_s22, 1 }
   0x9   : > { %p3039_p4 = por %p162_p2, %p161_p1  ;;  %s144_s26 = ssub.s32 %s2958_s19, %s4739_s23 }
   0xa   : > { %p2474_p6 = scmp.ge.s32.totalorder %s2962_s20, 1  ;;  %p149_p7 = scmp.eq.s32.totalorder %s144_s26, 0 }
   0xb   : > { %p3046_p8 = por %p168_p5, %p167_p3  ;;  %p213_p9 = scmp.lt.s32.totalorder %s2962_s20, 3 }
   0xc   : > { %s3052_s28 = scalar_select %p149_p7, %s2950_s17, %s151_s24  }
   0xd   : > { %p214_p10 = pnand %p2474_p6, %p213_p9 }
   0xf   : > { %217 = sbr.rel (%p214_p10) target bundleno = 888 (0x378), region = 36 }
  0x16   : > { %p249_p11 = scmp.lt.s32.totalorder %s2954_s18, 1  ;;  %s2964_s8 = smov 4   ;;  %vm1586_vm0 = vcmask 31744   ;;  %vm1619_vm1 = vcmask 64512   ;;  %vm1952_vm2 = vcmask 1043456   ;;  %vm1652_vm3 = vcmask 97280  }
  0x17   : > { %s2965_s9 = smov 8   ;;  %s2966_s10 = smov 12   ;;  %vm1685_vm4 = vcmask 130048   ;;  %vm1718_vm5 = vcmask 162816   ;;  %vm1751_vm6 = vcmask 195584   ;;  %vm1784_vm7 = vcmask 228352  }
  0x18   : > { %s250_s29 = scalar_select %p249_p11, %s2954_s18, 1  ;;  %vm1817_vm8 = vcmask 261120   ;;  %vm1855_vm9 = vcmask 293888  }
  0x19   : > { %s2967_s11 = smov 16   ;;  %s2968_s12 = smov 20  }
  0x1a   : > { %s2819_s30 = smul.u32 432, %s250_s29  ;;  %s2969_s13 = smov 24  }
  0x1b   : > { %s2970_s26 = smov 28   ;;  %s2971_s14 = smov 32  }
  0x1c   : > { %s3059_s7 = scalar_lea.vmem %s4601_s0, %s2819_s30 }
  0x1d   : > { %v3062_v0 = vld [vmem:[%s3059_s7 + $0x19] sm:$0xff]  ;;  %v300_v1 = vld [vmem:[%s3059_s7 + $0x1] sm:$0xff]  ;;  %v301_v3 = vld [vmem:[%s3059_s7 + $0x9] sm:$0xff] }
  0x1e   : > { %598 = vrot.lane.b32.xlu1 %v3062_v0, %s2964_s8  ;;  %594 = vrot.lane.b32.xlu0 %v300_v1, %s2964_s8  ;;  %v3069_v2 = vld [vmem:[%s3059_s7 + $0x21] sm:$0xff]  ;;  %v3076_v4 = vld [vmem:[%s3059_s7 + $0x39] sm:$0xff] }
  0x1f   : > { %v3079_v5 = vld [vmem:[%s3059_s7 + $0x31] sm:$0xff]  ;;  %v3089_v7 = vld [vmem:[%s3059_s7 + $0x49] sm:$0xff]  ;;  %v3097_v9 = vld [vmem:[%s3059_s7 + $0x61] sm:$0xff] }
  0x20   : > { %v3086_v6 = vld [vmem:[%s3059_s7 + $0x51] sm:$0xff]  ;;  %4650 = vst [vmem:[#allocation6_spill] sm:$0xff] %v3089_v7  ;;  %v309_v8 = vld [vmem:[%s3059_s7 + $0x69] sm:$0xff]  ;;  %4651 = vst [vmem:[#allocation7_spill] sm:$0xff] %v3097_v9 }
  0x21   : > { %4649 = vst [vmem:[#allocation5_spill] sm:$0xff] %v3086_v6  ;;  %v311_v10 = vld [vmem:[%s3059_s7 + $0x81] sm:$0xff]  ;;  %v310_v11 = vld [vmem:[%s3059_s7 + $0x79] sm:$0xff]  ;;  %v312_v13 = vld [vmem:[%s3059_s7 + $0x91] sm:$0xff] }
  0x22   : > { %600 = vrot.lane.b32.xlu1 %v3069_v2, %s2964_s8  ;;  %596 = vrot.lane.b32.xlu0 %v301_v3, %s2964_s8  ;;  %v313_v12 = vld [vmem:[%s3059_s7 + $0x99] sm:$0xff]  ;;  %v315_v14 = vld [vmem:[%s3059_s7 + $0xb1] sm:$0xff] }
  0x23   : > { %v314_v15 = vld [vmem:[%s3059_s7 + $0xa9] sm:$0xff]  ;;  %v316_v17 = vld [vmem:[%s3059_s7 + $0xc1] sm:$0xff]  ;;  %v3122_v19 = vld [vmem:[%s3059_s7 + $0xd9] sm:$0xff] }
  0x24   : > { %v317_v16 = vld [vmem:[%s3059_s7 + $0xc9] sm:$0xff]  ;;  %v3119_v18 = vld [vmem:[%s3059_s7 + $0xe1] sm:$0xff]  ;;  %v3129_v20 = vld [vmem:[%s3059_s7 + $0xf9] sm:$0xff] }
  0x25   : > { %v3132_v21 = vld [vmem:[%s3059_s7 + $0xf1] sm:$0xff]  ;;  %v3142_v23 = vld [vmem:[%s3059_s7 + $0x109] sm:$0xff]  ;;  %v3152_v25 = vld [vmem:[%s3059_s7 + $0x121] sm:$0xff] }
  0x26   : > { %604 = vrot.lane.b32.xlu1 %v3076_v4, %s2964_s8  ;;  %602 = vrot.lane.b32.xlu0 %v3079_v5, %s2964_s8  ;;  %v3139_v22 = vld [vmem:[%s3059_s7 + $0x111] sm:$0xff]  ;;  %4653 = vst [vmem:[#allocation9_spill] sm:$0xff] %v3142_v23  ;;  %v3149_v24 = vld [vmem:[%s3059_s7 + $0x129] sm:$0xff]  ;;  %4655 = vst [vmem:[#allocation11_spill] sm:$0xff] %v3152_v25 }
  0x27   : > { %4652 = vst [vmem:[#allocation8_spill] sm:$0xff] %v3139_v22  ;;  %4654 = vst [vmem:[#allocation10_spill] sm:$0xff] %v3149_v24  ;;  %v327_v26 = vld [vmem:[%s3059_s7 + $0x141] sm:$0xff]  ;;  %v326_v27 = vld [vmem:[%s3059_s7 + $0x139] sm:$0xff] }
  0x28   : > { %v329_v28 = vld [vmem:[%s3059_s7 + $0x159] sm:$0xff]  ;;  %v328_v29 = vld [vmem:[%s3059_s7 + $0x151] sm:$0xff]  ;;  %v330_v31 = vld [vmem:[%s3059_s7 + $0x169] sm:$0xff] }
  0x29   : > { %v331_v30 = vld [vmem:[%s3059_s7 + $0x171] sm:$0xff]  ;;  %v332_v33 = vld [vmem:[%s3059_s7 + $0x2] sm:$0xff]  ;;  %v3178_v35 = vld [vmem:[%s3059_s7 + $0x1a] sm:$0xff] }
  0x2a   : > { %608 = vrot.lane.b32.xlu1 %v3086_v6, %s2964_s8  ;;  %606 = vrot.lane.b32.xlu0 %v3089_v7, %s2964_s8  ;;  %v333_v32 = vld [vmem:[%s3059_s7 + $0xa] sm:$0xff]  ;;  %v3175_v34 = vld [vmem:[%s3059_s7 + $0x22] sm:$0xff] }
  0x2b   : > { %v3185_v36 = vld [vmem:[%s3059_s7 + $0x3a] sm:$0xff]  ;;  %v3188_v37 = vld [vmem:[%s3059_s7 + $0x32] sm:$0xff]  ;;  %v3198_v39 = vld [vmem:[%s3059_s7 + $0x4a] sm:$0xff] }
  0x2c   : > { %4656 = vst [vmem:[#allocation12_spill] sm:$0xff] %v3185_v36  ;;  %v3195_v38 = vld [vmem:[%s3059_s7 + $0x52] sm:$0xff]  ;;  %4658 = vst [vmem:[#allocation14_spill] sm:$0xff] %v3198_v39  ;;  %v3205_v40 = vld [vmem:[%s3059_s7 + $0x6a] sm:$0xff] }
  0x2d   : > { %4657 = vst [vmem:[#allocation13_spill] sm:$0xff] %v3195_v38  ;;  %4659 = vst [vmem:[#allocation15_spill] sm:$0xff] %v3205_v40  ;;  %v3208_v41 = vld [vmem:[%s3059_s7 + $0x62] sm:$0xff]  ;;  %v342_v43 = vld [vmem:[%s3059_s7 + $0x7a] sm:$0xff] }
  0x2e   : > { %612 = vrot.lane.b32.xlu1 %v309_v8, %s2964_s8  ;;  %610 = vrot.lane.b32.xlu0 %v3097_v9, %s2964_s8  ;;  %4660 = vst [vmem:[#allocation16_spill] sm:$0xff] %v3208_v41  ;;  %v343_v42 = vld [vmem:[%s3059_s7 + $0x82] sm:$0xff]  ;;  %v345_v44 = vld [vmem:[%s3059_s7 + $0x9a] sm:$0xff] }
  0x2f   : > { %v344_v45 = vld [vmem:[%s3059_s7 + $0x92] sm:$0xff]  ;;  %v346_v47 = vld [vmem:[%s3059_s7 + $0xaa] sm:$0xff]  ;;  %v348_v49 = vld [vmem:[%s3059_s7 + $0xc2] sm:$0xff] }
  0x30   : > { %v347_v46 = vld [vmem:[%s3059_s7 + $0xb2] sm:$0xff]  ;;  %v349_v48 = vld [vmem:[%s3059_s7 + $0xca] sm:$0xff]  ;;  %v3231_v50 = vld [vmem:[%s3059_s7 + $0xe2] sm:$0xff] }
  0x31   : > { %v3234_v51 = vld [vmem:[%s3059_s7 + $0xda] sm:$0xff]  ;;  %v3244_v53 = vld [vmem:[%s3059_s7 + $0xf2] sm:$0xff]  ;;  %v3254_v55 = vld [vmem:[%s3059_s7 + $0x10a] sm:$0xff] }
  0x32   : > { %616 = vrot.lane.b32.xlu1 %v311_v10, %s2964_s8  ;;  %614 = vrot.lane.b32.xlu0 %v310_v11, %s2964_s8  ;;  %v3241_v52 = vld [vmem:[%s3059_s7 + $0xfa] sm:$0xff]  ;;  %v3251_v54 = vld [vmem:[%s3059_s7 + $0x112] sm:$0xff]  ;;  %4663 = vst [vmem:[#allocation19_spill] sm:$0xff] %v3254_v55 }
  0x33   : > { %4661 = vst [vmem:[#allocation17_spill] sm:$0xff] %v3241_v52  ;;  %4662 = vst [vmem:[#allocation18_spill] sm:$0xff] %v3251_v54  ;;  %v3261_v56 = vld [vmem:[%s3059_s7 + $0x12a] sm:$0xff]  ;;  %v3264_v57 = vld [vmem:[%s3059_s7 + $0x122] sm:$0xff] }
  0x34   : > { %4664 = vst [vmem:[#allocation20_spill] sm:$0xff] %v3261_v56  ;;  %4665 = vst [vmem:[#allocation21_spill] sm:$0xff] %v3264_v57  ;;  %v359_v58 = vld [vmem:[%s3059_s7 + $0x142] sm:$0xff]  ;;  %v358_v59 = vld [vmem:[%s3059_s7 + $0x13a] sm:$0xff] }
  0x35   : > { %v361_v62 = vld [vmem:[%s3059_s7 + $0x15a] sm:$0xff]  ;;  %v360_v63 = vld [vmem:[%s3059_s7 + $0x152] sm:$0xff]  ;;  %v362_v10 = vld [vmem:[%s3059_s7 + $0x16a] sm:$0xff] }
  0x36   : > { %620 = vrot.lane.b32.xlu1 %v313_v12, %s2964_s8  ;;  %618 = vrot.lane.b32.xlu0 %v312_v13, %s2964_s8  ;;  %v363_v8 = vld [vmem:[%s3059_s7 + $0x172] sm:$0xff] }
  0x37   : > { %v3479_v6 = vld [vmem:[%s3059_s7 + $0x158] sm:$0xff] }
  0x3a   : > { %624 = vrot.lane.b32.xlu1 %v315_v14, %s2964_s8  ;;  %622 = vrot.lane.b32.xlu0 %v314_v15, %s2964_s8  ;;  %v3299_v15 = vld [vmem:[%s3059_s7 + $0x18] sm:$0xff] }
  0x3b   : > { %4670 = vst [vmem:[#allocation26_spill] sm:$0xff] %v3299_v15 }
  0x3e   : > { %628 = vrot.lane.b32.xlu1 %v317_v16, %s2964_s8  ;;  %626 = vrot.lane.b32.xlu0 %v316_v17, %s2964_s8  ;;  %v3302_v16 = vld [vmem:[%s3059_s7 + $0x20] sm:$0xff] }
  0x3f   : > { %4671 = vst [vmem:[#allocation27_spill] sm:$0xff] %v3302_v16 }
  0x42   : > { %632 = vrot.lane.b32.xlu1 %v3119_v18, %s2964_s8  ;;  %630 = vrot.lane.b32.xlu0 %v3122_v19, %s2964_s8 }
  0x46   : > { %636 = vrot.lane.b32.xlu1 %v3129_v20, %s2964_s8  ;;  %634 = vrot.lane.b32.xlu0 %v3132_v21, %s2964_s8 }
  0x4a   : > { %640 = vrot.lane.b32.xlu1 %v3139_v22, %s2964_s8  ;;  %638 = vrot.lane.b32.xlu0 %v3142_v23, %s2964_s8  ;;  %v3482_v22 = vld [vmem:[%s3059_s7 + $0x150] sm:$0xff]  ;;  %v3493_v23 = vld [vmem:[%s3059_s7 + $0x168] sm:$0xff] }
  0x4b   : > { %4686 = vst [vmem:[#allocation42_spill] sm:$0xff] %v3493_v23 }
  0x4e   : > { %644 = vrot.lane.b32.xlu1 %v3149_v24, %s2964_s8  ;;  %642 = vrot.lane.b32.xlu0 %v3152_v25, %s2964_s8  ;;  %v3462_v25 = vld [vmem:[%s3059_s7 + $0x140] sm:$0xff] }
  0x52   : > { %648 = vrot.lane.b32.xlu1 %v327_v26, %s2964_s8  ;;  %646 = vrot.lane.b32.xlu0 %v326_v27, %s2964_s8  ;;  %v3313_v27 = vld [vmem:[%s3059_s7 + $0x38] sm:$0xff] }
  0x56   : > { %652 = vrot.lane.b32.xlu1 %v329_v28, %s2964_s8  ;;  %650 = vrot.lane.b32.xlu0 %v328_v29, %s2964_s8  ;;  %v3316_v28 = vld [vmem:[%s3059_s7 + $0x30] sm:$0xff] }
  0x5a   : > { %656 = vrot.lane.b32.xlu1 %v331_v30, %s2964_s8  ;;  %654 = vrot.lane.b32.xlu0 %v330_v31, %s2964_s8  ;;  %v3327_v31 = vld [vmem:[%s3059_s7 + $0x50] sm:$0xff] }
  0x5e   : > { %724 = vrot.lane.b32.xlu1 %v333_v32, %s2965_s9  ;;  %722 = vrot.lane.b32.xlu0 %v332_v33, %s2965_s9  ;;  %v3330_v32 = vld [vmem:[%s3059_s7 + $0x48] sm:$0xff]  ;;  %v281_v33 = vld [vmem:[%s3059_s7 + $0x98] sm:$0xff] }
  0x62   : > { %728 = vrot.lane.b32.xlu1 %v3175_v34, %s2965_s9  ;;  %726 = vrot.lane.b32.xlu0 %v3178_v35, %s2965_s9 }
  0x66   : > { %732 = vrot.lane.b32.xlu1 %v3185_v36, %s2965_s9  ;;  %730 = vrot.lane.b32.xlu0 %v3188_v37, %s2965_s9 }
  0x6a   : > { %736 = vrot.lane.b32.xlu1 %v3195_v38, %s2965_s9  ;;  %734 = vrot.lane.b32.xlu0 %v3198_v39, %s2965_s9  ;;  %v3465_v38 = vld [vmem:[%s3059_s7 + $0x138] sm:$0xff] }
  0x6e   : > { %740 = vrot.lane.b32.xlu1 %v3205_v40, %s2965_s9  ;;  %738 = vrot.lane.b32.xlu0 %v3208_v41, %s2965_s9  ;;  %v3452_v41 = vld [vmem:[%s3059_s7 + $0x120] sm:$0xff] }
  0x72   : > { %744 = vrot.lane.b32.xlu1 %v343_v42, %s2965_s9  ;;  %742 = vrot.lane.b32.xlu0 %v342_v43, %s2965_s9  ;;  %v280_v42 = vld [vmem:[%s3059_s7 + $0x90] sm:$0xff] }
  0x76   : > { %748 = vrot.lane.b32.xlu1 %v345_v44, %s2965_s9  ;;  %746 = vrot.lane.b32.xlu0 %v344_v45, %s2965_s9  ;;  %v3339_v45 = vld [vmem:[%s3059_s7 + $0x68] sm:$0xff] }
  0x7a   : > { %752 = vrot.lane.b32.xlu1 %v347_v46, %s2965_s9  ;;  %750 = vrot.lane.b32.xlu0 %v346_v47, %s2965_s9  ;;  %v3342_v46 = vld [vmem:[%s3059_s7 + $0x60] sm:$0xff] }
  0x7e   : > { %756 = vrot.lane.b32.xlu1 %v349_v48, %s2965_s9  ;;  %754 = vrot.lane.b32.xlu0 %v348_v49, %s2965_s9  ;;  %v283_v49 = vld [vmem:[%s3059_s7 + $0xb0] sm:$0xff] }
  0x82   : > { %760 = vrot.lane.b32.xlu1 %v3231_v50, %s2965_s9  ;;  %758 = vrot.lane.b32.xlu0 %v3234_v51, %s2965_s9 }
  0x86   : > { %764 = vrot.lane.b32.xlu1 %v3241_v52, %s2965_s9  ;;  %762 = vrot.lane.b32.xlu0 %v3244_v53, %s2965_s9 }
  0x8a   : > { %768 = vrot.lane.b32.xlu1 %v3251_v54, %s2965_s9  ;;  %766 = vrot.lane.b32.xlu0 %v3254_v55, %s2965_s9 }
  0x8e   : > { %772 = vrot.lane.b32.xlu1 %v3261_v56, %s2965_s9  ;;  %770 = vrot.lane.b32.xlu0 %v3264_v57, %s2965_s9  ;;  %v3449_v56 = vld [vmem:[%s3059_s7 + $0x128] sm:$0xff]  ;;  %v299_v57 = vld [vmem:[%s3059_s7 + $0x170] sm:$0xff] }
  0x90   : > { %v3272_v60 = vpop.permute.xlu1 %598  ;;  %v3274_v61 = vpop.permute.xlu0 %594 }
  0x91   : > { %4666 = vst [vmem:[#allocation22_spill] sm:$0xff] %v3272_v60  ;;  %4667 = vst [vmem:[#allocation23_spill] sm:$0xff] %v3274_v61 }
  0x92   : > { %776 = vrot.lane.b32.xlu1 %v359_v58, %s2965_s9  ;;  %774 = vrot.lane.b32.xlu0 %v358_v59, %s2965_s9  ;;  %v282_v58 = vld [vmem:[%s3059_s7 + $0xa8] sm:$0xff] }
  0x94   : > { %v3280_v1 = vpop.permute.xlu1 %600  ;;  %v3282_v3 = vpop.permute.xlu0 %596 }
  0x95   : > { %4668 = vst [vmem:[#allocation24_spill] sm:$0xff] %v3280_v1  ;;  %4669 = vst [vmem:[#allocation25_spill] sm:$0xff] %v3282_v3  ;;  %v3385_v1 = vld [vmem:[%s3059_s7 + $0xf8] sm:$0xff]  ;;  %v3391_v3 = vld [vmem:[%s3059_s7 + $0xc8] sm:$0xff] }
  0x96   : > { %780 = vrot.lane.b32.xlu1 %v361_v62, %s2965_s9  ;;  %778 = vrot.lane.b32.xlu0 %v360_v63, %s2965_s9  ;;  %v3357_v63 = vld [vmem:[%s3059_s7 + $0x80] sm:$0xff]  ;;  %4676 = vst [vmem:[#allocation32_spill] sm:$0xff] %v3391_v3 }
  0x98   : > { %v3288_v11 = vpop.permute.xlu1 %604  ;;  %v3290_v12 = vpop.permute.xlu0 %602 }
  0x99   : > { %v1592_v36 = vsel %vm1586_vm0, %v3313_v27, %v3288_v11  ;;  %v1591_v52 = vsel %vm1586_vm0, %v3316_v28, %v3290_v12 }
  0x9a   : > { %784 = vrot.lane.b32.xlu1 %v363_v8, %s2965_s9  ;;  %782 = vrot.lane.b32.xlu0 %v362_v10, %s2965_s9  ;;  %v3360_v8 = vld [vmem:[%s3059_s7 + $0x78] sm:$0xff] }
  0x9c   : > { %v3294_v13 = vpop.permute.xlu1 %608  ;;  %v3296_v14 = vpop.permute.xlu0 %606 }
  0x9d   : > { %v1594_v11 = vsel %vm1586_vm0, %v3327_v31, %v3294_v13  ;;  %v1593_v12 = vsel %vm1586_vm0, %v3330_v32, %v3296_v14 }
  0x9e   : > { %852 = vrot.lane.b32.xlu1 %v3302_v16, %s2966_s10  ;;  %850 = vrot.lane.b32.xlu0 %v3299_v15, %s2966_s10  ;;  %v3388_v15 = vld [vmem:[%s3059_s7 + $0xf0] sm:$0xff] }
  0xa0   : > { %v3308_v17 = vpop.permute.xlu1 %612  ;;  %v3310_v26 = vpop.permute.xlu0 %610 }
  0xa2   : > { %856 = vrot.lane.b32.xlu1 %v3313_v27, %s2966_s10  ;;  %854 = vrot.lane.b32.xlu0 %v3316_v28, %s2966_s10 }
  0xa4   : > { %v3322_v29 = vpop.permute.xlu1 %616  ;;  %v3324_v30 = vpop.permute.xlu0 %614 }
  0xa6   : > { %860 = vrot.lane.b32.xlu1 %v3327_v31, %s2966_s10  ;;  %858 = vrot.lane.b32.xlu0 %v3330_v32, %s2966_s10 }
  0xa8   : > { %v621_v43 = vpop.permute.xlu1 %620  ;;  %v619_v44 = vpop.permute.xlu0 %618 }
  0xa9   : > { %v3345_v47 = vsel %vm1586_vm0, %v281_v33, %v621_v43  ;;  %v3348_v48 = vsel %vm1586_vm0, %v280_v42, %v619_v44 }
  0xaa   : > { %864 = vrot.lane.b32.xlu1 %v3339_v45, %s2966_s10  ;;  %862 = vrot.lane.b32.xlu0 %v3342_v46, %s2966_s10 }
  0xac   : > { %v625_v59 = vpop.permute.xlu1 %624  ;;  %v623_v62 = vpop.permute.xlu0 %622 }
  0xad   : > { %v3363_v10 = vsel %vm1586_vm0, %v283_v49, %v625_v59  ;;  %v3366_v43 = vsel %vm1586_vm0, %v282_v58, %v623_v62 }
  0xae   : > { %868 = vrot.lane.b32.xlu1 %v3357_v63, %s2966_s10  ;;  %866 = vrot.lane.b32.xlu0 %v3360_v8, %s2966_s10 }
  0xb0   : > { %v3372_v44 = vpop.permute.xlu1 %628  ;;  %v3374_v16 = vpop.permute.xlu0 %626 }
  0xb1   : > { %4672 = vst [vmem:[#allocation28_spill] sm:$0xff] %v3372_v44  ;;  %4673 = vst [vmem:[#allocation29_spill] sm:$0xff] %v3374_v16 }
  0xb2   : > { %872 = vrot.lane.b32.xlu1 %v281_v33, %s2966_s10  ;;  %870 = vrot.lane.b32.xlu0 %v280_v42, %s2966_s10  ;;  %v3394_v33 = vld [vmem:[%s3059_s7 + $0xc0] sm:$0xff] }
  0xb3   : > { %4677 = vst [vmem:[#allocation33_spill] sm:$0xff] %v3394_v33 }
  0xb4   : > { %v3378_v59 = vpop.permute.xlu1 %632  ;;  %v3380_v62 = vpop.permute.xlu0 %630 }
  0xb5   : > { %4674 = vst [vmem:[#allocation30_spill] sm:$0xff] %v3378_v59  ;;  %4675 = vst [vmem:[#allocation31_spill] sm:$0xff] %v3380_v62  ;;  %v3413_v62 = vld [vmem:[%s3059_s7 + $0xe0] sm:$0xff] }
  0xb6   : > { %876 = vrot.lane.b32.xlu1 %v283_v49, %s2966_s10  ;;  %874 = vrot.lane.b32.xlu0 %v282_v58, %s2966_s10  ;;  %4678 = vst [vmem:[#allocation34_spill] sm:$0xff] %v3413_v62 }
  0xb8   : > { %v637_v60 = vpop.permute.xlu1 %636  ;;  %v635_v44 = vpop.permute.xlu0 %634 }
  0xb9   : > { %v3398_v42 = vsel %vm1586_vm0, %v3385_v1, %v637_v60  ;;  %v3402_v49 = vsel %vm1586_vm0, %v3388_v15, %v635_v44  ;;  %v3416_v60 = vld [vmem:[%s3059_s7 + $0xd8] sm:$0xff] }
  0xba   : > { %880 = vrot.lane.b32.xlu1 %v3391_v3, %s2966_s10  ;;  %878 = vrot.lane.b32.xlu0 %v3394_v33, %s2966_s10  ;;  %4679 = vst [vmem:[#allocation35_spill] sm:$0xff] %v3416_v60 }
  0xbc   : > { %v3408_v58 = vpop.permute.xlu1 %640  ;;  %v3410_v59 = vpop.permute.xlu0 %638 }
  0xbe   : > { %884 = vrot.lane.b32.xlu1 %v3413_v62, %s2966_s10  ;;  %882 = vrot.lane.b32.xlu0 %v3416_v60, %s2966_s10  ;;  %v3435_v62 = vld [vmem:[%s3059_s7 + $0x110] sm:$0xff]  ;;  %v3438_v60 = vld [vmem:[%s3059_s7 + $0x108] sm:$0xff] }
  0xc0   : > { %v3422_v44 = vpop.permute.xlu1 %644  ;;  %v3424_v3 = vpop.permute.xlu0 %642 }
  0xc2   : > { %888 = vrot.lane.b32.xlu1 %v3385_v1, %s2966_s10  ;;  %886 = vrot.lane.b32.xlu0 %v3388_v15, %s2966_s10 }
  0xc4   : > { %v3430_v33 = vpop.permute.xlu1 %648  ;;  %v3432_v16 = vpop.permute.xlu0 %646 }
  0xc6   : > { %892 = vrot.lane.b32.xlu1 %v3435_v62, %s2966_s10  ;;  %890 = vrot.lane.b32.xlu0 %v3438_v60, %s2966_s10 }
  0xc8   : > { %v3444_v61 = vpop.permute.xlu1 %652  ;;  %v3446_v40 = vpop.permute.xlu0 %650 }
  0xca   : > { %896 = vrot.lane.b32.xlu1 %v3449_v56, %s2966_s10  ;;  %894 = vrot.lane.b32.xlu0 %v3452_v41, %s2966_s10 }
  0xcc   : > { %v657_v24 = vpop.permute.xlu1 %656  ;;  %v3459_v9 = vpop.permute.xlu0 %654 }
  0xcd   : > { %4680 = vst [vmem:[#allocation36_spill] sm:$0xff] %v3459_v9  ;;  %v3468_v54 = vsel %vm1586_vm0, %v299_v57, %v657_v24 }
  0xce   : > { %4681 = vst [vmem:[#allocation37_spill] sm:$0xff] %v3468_v54  ;;  %900 = vrot.lane.b32.xlu1 %v3462_v25, %s2966_s10  ;;  %898 = vrot.lane.b32.xlu0 %v3465_v38, %s2966_s10 }
  0xd0   : > { %v3474_v39 = vpop.permute.xlu1 %724  ;;  %v3476_v55 = vpop.permute.xlu0 %722 }
  0xd1   : > { %4682 = vst [vmem:[#allocation38_spill] sm:$0xff] %v3474_v39  ;;  %4683 = vst [vmem:[#allocation39_spill] sm:$0xff] %v3476_v55  ;;  %v2508_v39 = vld [vmem:[%s3059_s7 + $0x188] sm:$0xff]  ;;  %v2507_v55 = vld [vmem:[%s3059_s7 + $0x180] sm:$0xff] }
  0xd2   : > { %904 = vrot.lane.b32.xlu1 %v3479_v6, %s2966_s10  ;;  %902 = vrot.lane.b32.xlu0 %v3482_v22, %s2966_s10 }
  0xd4   : > { %v3488_v24 = vpop.permute.xlu1 %728  ;;  %v3490_v7 = vpop.permute.xlu0 %726 }
  0xd5   : > { %4684 = vst [vmem:[#allocation40_spill] sm:$0xff] %v3488_v24  ;;  %4685 = vst [vmem:[#allocation41_spill] sm:$0xff] %v3490_v7 }
  0xd6   : > { %908 = vrot.lane.b32.xlu1 %v299_v57, %s2966_s10  ;;  %906 = vrot.lane.b32.xlu0 %v3493_v23, %s2966_s10 }
  0xd8   : > { %v733_v24 = vpop.permute.xlu1 %732  ;;  %v731_v7 = vpop.permute.xlu0 %730 }
  0xd9   : > { %v3507_v54 = vsel %vm1619_vm1, %v1592_v36, %v733_v24  ;;  %v3510_v57 = vsel %vm1619_vm1, %v1591_v52, %v731_v7  ;;  %v1595_v52 = vsel %vm1586_vm0, %v3342_v46, %v3310_v26 }
  0xda   : > { %912 = vrot.lane.b32.xlu1 %v2508_v39, %s2966_s10  ;;  %910 = vrot.lane.b32.xlu0 %v2507_v55, %s2966_s10  ;;  %v1596_v39 = vsel %vm1586_vm0, %v3339_v45, %v3308_v17  ;;  %s2972_s10 = smov [#allocation2]  }
  0xdc   : > { %v737_v23 = vpop.permute.xlu1 %736  ;;  %v735_v9 = vpop.permute.xlu0 %734 }
  0xdd   : > { %v3521_v36 = vsel %vm1619_vm1, %v1594_v11, %v737_v23  ;;  %v3524_v7 = vsel %vm1619_vm1, %v1593_v12, %v735_v9 }
  0xde   : > { %980 = vrot.lane.b32.xlu1 %v3069_v2, %s2967_s11  ;;  %978 = vrot.lane.b32.xlu0 %v3062_v0, %s2967_s11  ;;  %v1598_v0 = vsel %vm1586_vm0, %v3357_v63, %v3322_v29  ;;  %v1597_v2 = vsel %vm1586_vm0, %v3360_v8, %v3324_v30 }
  0xe0   : > { %v741_v23 = vpop.permute.xlu1 %740  ;;  %v739_v55 = vpop.permute.xlu0 %738 }
  0xe1   : > { %v3537_v9 = vsel %vm1619_vm1, %v1596_v39, %v741_v23  ;;  %v3540_v13 = vsel %vm1619_vm1, %v1595_v52, %v739_v55  ;;  %v1609_v23 = vsel %vm1586_vm0, %v3438_v60, %v3410_v59  ;;  %v1612_v59 = vsel %vm1586_vm0, %v3449_v56, %v3422_v44 }
  0xe2   : > { %984 = vrot.lane.b32.xlu1 %v3076_v4, %s2967_s11  ;;  %982 = vrot.lane.b32.xlu0 %v3079_v5, %s2967_s11  ;;  %v1613_v44 = vsel %vm1586_vm0, %v3465_v38, %v3432_v16  ;;  %v1616_v16 = vsel %vm1586_vm0, %v3479_v6, %v3444_v61  ;;  %v4688_v61 = vld [vmem:[#allocation42_spill] sm:$0xff] }
  0xe4   : > { %v745_v14 = vpop.permute.xlu1 %744  ;;  %v743_v17 = vpop.permute.xlu0 %742 }
  0xe5   : > { %v3553_v26 = vsel %vm1619_vm1, %v1598_v0, %v745_v14  ;;  %v3556_v24 = vsel %vm1619_vm1, %v1597_v2, %v743_v17  ;;  %v1611_v17 = vsel %vm1586_vm0, %v3452_v41, %v3424_v3  ;;  %v1614_v3 = vsel %vm1586_vm0, %v3462_v25, %v3430_v33 }
  0xe6   : > { %1012 = vrot.lane.b32.xlu1 %v3119_v18, %s2967_s11  ;;  %1010 = vrot.lane.b32.xlu0 %v3122_v19, %s2967_s11  ;;  %v1615_v33 = vsel %vm1586_vm0, %v3482_v22, %v3446_v40 }
  0xe8   : > { %v749_v11 = vpop.permute.xlu1 %748  ;;  %v747_v29 = vpop.permute.xlu0 %746 }
  0xe9   : > { %v3564_v12 = vsel %vm1619_vm1, %v3345_v47, %v749_v11  ;;  %v3568_v30 = vsel %vm1619_vm1, %v3348_v48, %v747_v29 }
  0xea   : > { %1138 = vrot.lane.b32.xlu1 %v3234_v51, %s2968_s12  ;;  %1106 = vrot.lane.b32.xlu0 %v3178_v35, %s2968_s12 }
  0xec   : > { %v753_v18 = vpop.permute.xlu1 %752  ;;  %v751_v39 = vpop.permute.xlu0 %750 }
  0xed   : > { %v3576_v19 = vsel %vm1619_vm1, %v3363_v10, %v753_v18  ;;  %v3580_v47 = vsel %vm1619_vm1, %v3366_v43, %v751_v39 }
  0xee   : > { %1140 = vrot.lane.b32.xlu1 %v3231_v50, %s2968_s12  ;;  %1108 = vrot.lane.b32.xlu0 %v3175_v34, %s2968_s12  ;;  %v1850_v34 = vld [vmem:[%s4602_s1] sm:$0xff]  ;;  %v1851_v50 = vld [vmem:[%s4602_s1 + $0x8] sm:$0xff] }
  0xf0   : > { %v3586_v51 = vpop.permute.xlu1 %756  ;;  %v3588_v48 = vpop.permute.xlu0 %754 }
  0xf2   : > { %1266 = vrot.lane.b32.xlu1 %v3388_v15, %s2969_s13  ;;  %1234 = vrot.lane.b32.xlu0 %v3316_v28, %s2969_s13  ;;  %v2805_v15 = vpack.c.bf16 %v1851_v50, %v1850_v34 }
  0xf4   : > { %v3594_v35 = vpop.permute.xlu1 %760  ;;  %v3596_v10 = vpop.permute.xlu0 %758  ;;  %2806 = vmatprep.subr.bf16.mxu0 %v2805_v15  ;;  %2813 = vmatprep.subr.bf16.mxu1 %v2805_v15 }
  0xf5   : > { %2808 = vmatpush3.bf16.msra.mxu0 %v2805_v15  ;;  %2816 = vmatpush3.bf16.msra.mxu1 %v2805_v15 }
  0xf6   : > { %1268 = vrot.lane.b32.xlu1 %v3385_v1, %s2969_s13  ;;  %1236 = vrot.lane.b32.xlu0 %v3313_v27, %s2969_s13  ;;  %v1852_v27 = vld [vmem:[%s4602_s1 + $0x10] sm:$0xff] }
  0xf8   : > { %v765_v28 = vpop.permute.xlu1 %764  ;;  %v763_v43 = vpop.permute.xlu0 %762 }
  0xf9   : > { %v3610_v52 = vsel %vm1619_vm1, %v3398_v42, %v765_v28  ;;  %v3614_v1 = vsel %vm1619_vm1, %v3402_v49, %v763_v43  ;;  %v1853_v42 = vld [vmem:[%s4602_s1 + $0x18] sm:$0xff]  ;;  %v1610_v49 = vsel %vm1586_vm0, %v3435_v62, %v3408_v58  ;;  %v1854_v58 = vld [vmem:[%s4602_s1 + $0x20] sm:$0xf] }
  0xfa   : > { %1394 = vrot.lane.b32.xlu1 %v3132_v21, %s2970_s26  ;;  %1362 = vrot.lane.b32.xlu0 %v3079_v5, %s2970_s26  ;;  %v2809_v0 = vpack.c.bf16 %v1853_v42, %v1852_v27 }
  0xfc   : > { %v769_v55 = vpop.permute.xlu1 %768  ;;  %v767_v5 = vpop.permute.xlu0 %766  ;;  %2810 = vmatprep.subr.bf16.mxu0 %v2809_v0  ;;  %2814 = vmatprep.subr.bf16.mxu1 %v2809_v0 }
  0xfd   : > { %v3633_v2 = vsel %vm1619_vm1, %v1610_v49, %v769_v55  ;;  %v3636_v14 = vsel %vm1619_vm1, %v1609_v23, %v767_v5  ;;  %2812 = vmatpush3.bf16.msra.mxu0 %v2809_v0  ;;  %2817 = vmatpush3.bf16.msra.mxu1 %v2809_v0  ;;  %v4689_v23 = vld [vmem:[#allocation37_spill] sm:$0xff] }
  0xfe   : > { %1364 = vrot.lane.b32.xlu1 %v3076_v4, %s2970_s26  ;;  %1014 = vrot.lane.b32.xlu0 %v3132_v21, %s2967_s11  ;;  %v4690_v0 = vld [vmem:[#allocation17_spill] sm:$0xff] }
  0xff   : > { %2755 = vmatprep.subr.msk.mxu0 %vm1952_vm2, %v1854_v58  ;;  %2815 = vmatprep.subr.msk.mxu1 %vm1952_vm2, %v1854_v58 }
 0x100   : > { %v773_v11 = vpop.permute.xlu1 %772  ;;  %v771_v4 = vpop.permute.xlu0 %770 }
 0x101   : > { %v3652_v21 = vsel %vm1619_vm1, %v1612_v59, %v773_v11  ;;  %v3655_v29 = vsel %vm1619_vm1, %v1611_v17, %v771_v4  ;;  %2756 = vmatpush3.msk.msra.mxu0 %vm1952_vm2, %v1854_v58  ;;  %2818 = vmatpush3.msk.msra.mxu1 %vm1952_vm2, %v1854_v58 }
 0x102   : > { %1490 = vrot.lane.b32.xlu1 %v3188_v37, %s2971_s14  ;;  %1396 = vrot.lane.b32.xlu0 %v3129_v20, %s2970_s26 }
 0x104   : > { %v777_v18 = vpop.permute.xlu1 %776  ;;  %v775_v39 = vpop.permute.xlu0 %774 }
 0x105   : > { %v3672_v34 = vsel %vm1619_vm1, %v1614_v3, %v777_v18  ;;  %v3675_v50 = vsel %vm1619_vm1, %v1613_v44, %v775_v39  ;;  %v4692_v39 = vld [vmem:[#allocation9_spill] sm:$0xff] }
 0x106   : > { %1016 = vrot.lane.b32.xlu1 %v3129_v20, %s2967_s11  ;;  %1522 = vrot.lane.b32.xlu0 %v3244_v53, %s2971_s14  ;;  %v4687_v20 = vld [vmem:[#allocation36_spill] sm:$0xff] }
 0x107   : > { %v1617_v42 = vsel %vm1586_vm0, %v4688_v61, %v4687_v20 }
 0x108   : > { %v781_v15 = vpop.permute.xlu1 %780  ;;  %v779_v28 = vpop.permute.xlu0 %778 }
 0x109   : > { %v3688_v43 = vsel %vm1619_vm1, %v1616_v16, %v781_v15  ;;  %v3691_v27 = vsel %vm1619_vm1, %v1615_v33, %v779_v28  ;;  %v4694_v28 = vld [vmem:[#allocation8_spill] sm:$0xff] }
 0x10a   : > { %1142 = vrot.lane.b32.xlu1 %v3244_v53, %s2968_s12  ;;  %1110 = vrot.lane.b32.xlu0 %v3188_v37, %s2968_s12  ;;  %v4691_v53 = vld [vmem:[#allocation12_spill] sm:$0xff] }
 0x10c   : > { %v785_v49 = vpop.permute.xlu1 %784  ;;  %v783_v40 = vpop.permute.xlu0 %782 }
 0x10d   : > { %v3702_v55 = vsel %vm1619_vm1, %v4689_v23, %v785_v49  ;;  %v3705_v5 = vsel %vm1619_vm1, %v1617_v42, %v783_v40  ;;  %v4696_v40 = vld [vmem:[#allocation19_spill] sm:$0xff] }
 0x10e   : > { %1524 = vrot.lane.b32.xlu1 %v4690_v0, %s2971_s14  ;;  %1492 = vrot.lane.b32.xlu0 %v4691_v53, %s2971_s14 }
 0x110   : > { %v3711_v37 = vpop.permute.xlu1 %852  ;;  %v3713_v58 = vpop.permute.xlu0 %850 }
 0x112   : > { %1144 = vrot.lane.b32.xlu1 %v4690_v0, %s2968_s12  ;;  %1112 = vrot.lane.b32.xlu0 %v4691_v53, %s2968_s12 }
 0x114   : > { %v3719_v59 = vpop.permute.xlu1 %856  ;;  %v3721_v17 = vpop.permute.xlu0 %854 }
 0x116   : > { %1270 = vrot.lane.b32.xlu1 %v3438_v60, %s2969_s13  ;;  %1238 = vrot.lane.b32.xlu0 %v3330_v32, %s2969_s13 }
 0x118   : > { %v861_v11 = vpop.permute.xlu1 %860  ;;  %v859_v4 = vpop.permute.xlu0 %858 }
 0x119   : > { %v3729_v3 = vsel %vm1652_vm3, %v3507_v54, %v861_v11  ;;  %v3733_v44 = vsel %vm1652_vm3, %v3510_v57, %v859_v4  ;;  %v4693_v57 = vld [vmem:[#allocation6_spill] sm:$0xff] }
 0x11a   : > { %1272 = vrot.lane.b32.xlu1 %v3435_v62, %s2969_s13  ;;  %1240 = vrot.lane.b32.xlu0 %v3327_v31, %s2969_s13  ;;  %v4700_v4 = vld [vmem:[#allocation18_spill] sm:$0xff] }
 0x11c   : > { %v865_v60 = vpop.permute.xlu1 %864  ;;  %v863_v18 = vpop.permute.xlu0 %862 }
 0x11d   : > { %v3741_v32 = vsel %vm1652_vm3, %v3521_v36, %v865_v60  ;;  %v3745_v54 = vsel %vm1652_vm3, %v3524_v7, %v863_v18  ;;  %v4701_v60 = vld [vmem:[#allocation13_spill] sm:$0xff] }
 0x11e   : > { %1398 = vrot.lane.b32.xlu1 %v4692_v39, %s2970_s26  ;;  %1366 = vrot.lane.b32.xlu0 %v4693_v57, %s2970_s26 }
 0x120   : > { %v869_v62 = vpop.permute.xlu1 %868  ;;  %v867_v16 = vpop.permute.xlu0 %866 }
 0x121   : > { %v3753_v31 = vsel %vm1652_vm3, %v3537_v9, %v869_v62  ;;  %v3757_v36 = vsel %vm1652_vm3, %v3540_v13, %v867_v16  ;;  %v4695_v13 = vld [vmem:[#allocation5_spill] sm:$0xff] }
 0x122   : > { %1018 = vrot.lane.b32.xlu1 %v4692_v39, %s2967_s11  ;;  %986 = vrot.lane.b32.xlu0 %v4693_v57, %s2967_s11 }
 0x124   : > { %v873_v7 = vpop.permute.xlu1 %872  ;;  %v871_v33 = vpop.permute.xlu0 %870 }
 0x125   : > { %v3765_v15 = vsel %vm1652_vm3, %v3553_v26, %v873_v7  ;;  %v3769_v9 = vsel %vm1652_vm3, %v3556_v24, %v871_v33  ;;  %v4697_v24 = vld [vmem:[#allocation14_spill] sm:$0xff] }
 0x126   : > { %1400 = vrot.lane.b32.xlu1 %v4694_v28, %s2970_s26  ;;  %1368 = vrot.lane.b32.xlu0 %v4695_v13, %s2970_s26 }
 0x128   : > { %v877_v20 = vpop.permute.xlu1 %876  ;;  %v875_v42 = vpop.permute.xlu0 %874 }
 0x129   : > { %v3777_v49 = vsel %vm1652_vm3, %v3564_v12, %v877_v20  ;;  %v3781_v26 = vsel %vm1652_vm3, %v3568_v30, %v875_v42  ;;  %v4703_v20 = vld [vmem:[#allocation7_spill] sm:$0xff] }
 0x12a   : > { %1526 = vrot.lane.b32.xlu1 %v4696_v40, %s2971_s14  ;;  %1494 = vrot.lane.b32.xlu0 %v4697_v24, %s2971_s14 }
 0x12c   : > { %v881_v23 = vpop.permute.xlu1 %880  ;;  %v879_v0 = vpop.permute.xlu0 %878 }
 0x12d   : > { %v3789_v53 = vsel %vm1652_vm3, %v3576_v19, %v881_v23  ;;  %v3793_v12 = vsel %vm1652_vm3, %v3580_v47, %v879_v0 }
 0x12e   : > { %4698 = vst [vmem:[#allocation36_spill] sm:$0xff] %v3789_v53  ;;  %4699 = vst [vmem:[#allocation42_spill] sm:$0xff] %v3793_v12  ;;  %1020 = vrot.lane.b32.xlu1 %v4694_v28, %s2967_s11  ;;  %988 = vrot.lane.b32.xlu0 %v4695_v13, %s2967_s11 }
 0x130   : > { %v3799_v30 = vpop.permute.xlu1 %884  ;;  %v3801_v11 = vpop.permute.xlu0 %882 }
 0x132   : > { %1146 = vrot.lane.b32.xlu1 %v4696_v40, %s2968_s12  ;;  %1114 = vrot.lane.b32.xlu0 %v4697_v24, %s2968_s12 }
 0x134   : > { %v3807_v19 = vpop.permute.xlu1 %888  ;;  %v3809_v47 = vpop.permute.xlu0 %886 }
 0x136   : > { %1528 = vrot.lane.b32.xlu1 %v4700_v4, %s2971_s14  ;;  %1496 = vrot.lane.b32.xlu0 %v4701_v60, %s2971_s14 }
 0x138   : > { %v893_v18 = vpop.permute.xlu1 %892  ;;  %v891_v39 = vpop.permute.xlu0 %890 }
 0x139   : > { %v3817_v57 = vsel %vm1652_vm3, %v3610_v52, %v893_v18  ;;  %v3821_v62 = vsel %vm1652_vm3, %v3614_v1, %v891_v39  ;;  %v4707_v18 = vld [vmem:[#allocation21_spill] sm:$0xff]  ;;  %v4708_v39 = vld [vmem:[#allocation16_spill] sm:$0xff] }
 0x13a   : > { %1148 = vrot.lane.b32.xlu1 %v4700_v4, %s2968_s12  ;;  %1116 = vrot.lane.b32.xlu0 %v4701_v60, %s2968_s12  ;;  %v4706_v4 = vld [vmem:[#allocation10_spill] sm:$0xff] }
 0x13c   : > { %v897_v16 = vpop.permute.xlu1 %896  ;;  %v895_v7 = vpop.permute.xlu0 %894 }
 0x13d   : > { %v3829_v33 = vsel %vm1652_vm3, %v3633_v2, %v897_v16  ;;  %v3833_v52 = vsel %vm1652_vm3, %v3636_v14, %v895_v7 }
 0x13e   : > { %1274 = vrot.lane.b32.xlu1 %v3452_v41, %s2969_s13  ;;  %1242 = vrot.lane.b32.xlu0 %v3342_v46, %s2969_s13 }
 0x140   : > { %v901_v1 = vpop.permute.xlu1 %900  ;;  %v899_v28 = vpop.permute.xlu0 %898 }
 0x141   : > { %v3841_v13 = vsel %vm1652_vm3, %v3652_v21, %v901_v1  ;;  %v3845_v2 = vsel %vm1652_vm3, %v3655_v29, %v899_v28  ;;  %v4702_v29 = vld [vmem:[#allocation11_spill] sm:$0xff] }
 0x142   : > { %1276 = vrot.lane.b32.xlu1 %v3449_v56, %s2969_s13  ;;  %1244 = vrot.lane.b32.xlu0 %v3339_v45, %s2969_s13  ;;  %v2515_v56 = vld [vmem:[%s3059_s7 + $0x61] sm:$0xff] }
 0x144   : > { %v905_v41 = vpop.permute.xlu1 %904  ;;  %v903_v14 = vpop.permute.xlu0 %902 }
 0x145   : > { %v3853_v46 = vsel %vm1652_vm3, %v3672_v34, %v905_v41  ;;  %v3857_v21 = vsel %vm1652_vm3, %v3675_v50, %v903_v14  ;;  %v2610_v50 = vld [vmem:[%s3059_s7 + $0x69] sm:$0xff]  ;;  %v4709_v41 = vld [vmem:[#allocation20_spill] sm:$0xff] }
 0x146   : > { %1402 = vrot.lane.b32.xlu1 %v4702_v29, %s2970_s26  ;;  %1370 = vrot.lane.b32.xlu0 %v4703_v20, %s2970_s26  ;;  %v4710_v14 = vld [vmem:[#allocation15_spill] sm:$0xff] }
 0x148   : > { %v909_v42 = vpop.permute.xlu1 %908  ;;  %v907_v40 = vpop.permute.xlu0 %906 }
 0x149   : > { %v3866_v45 = vsel %vm1652_vm3, %v3688_v43, %v909_v42  ;;  %v3870_v34 = vsel %vm1652_vm3, %v3691_v27, %v907_v40 }
 0x14a   : > { %1022 = vrot.lane.b32.xlu1 %v4702_v29, %s2967_s11  ;;  %990 = vrot.lane.b32.xlu0 %v2515_v56, %s2967_s11 }
 0x14c   : > { %v913_v24 = vpop.permute.xlu1 %912  ;;  %v911_v23 = vpop.permute.xlu0 %910 }
 0x14d   : > { %v3878_v0 = vsel %vm1652_vm3, %v3702_v55, %v913_v24  ;;  %v3882_v43 = vsel %vm1652_vm3, %v3705_v5, %v911_v23  ;;  %v268_v24 = vld [vmem:[%s3059_s7] sm:$0xff] }
 0x14e   : > { %4704 = vst [vmem:[#allocation37_spill] sm:$0xff] %v3878_v0  ;;  %4705 = vst [vmem:[#allocation17_spill] sm:$0xff] %v3882_v43  ;;  %1404 = vrot.lane.b32.xlu1 %v4706_v4, %s2970_s26  ;;  %1372 = vrot.lane.b32.xlu0 %v2610_v50, %s2970_s26  ;;  %v2627_v23 = vld [vmem:[%s3059_s7 + $0x139] sm:$0xff] }
 0x14f   : > { %v4714_v0 = vld [vmem:[#allocation33_spill] sm:$0xff] }
 0x150   : > { %v3887_v27 = vpop.permute.xlu1 %980  ;;  %v979_v60 = vpop.permute.xlu0 %978 }
 0x152   : > { %1530 = vrot.lane.b32.xlu1 %v4707_v18, %s2971_s14  ;;  %1498 = vrot.lane.b32.xlu0 %v4708_v39, %s2971_s14 }
 0x154   : > { %v3893_v55 = vpop.permute.xlu1 %984  ;;  %v3895_v16 = vpop.permute.xlu0 %982 }
 0x156   : > { %1024 = vrot.lane.b32.xlu1 %v4706_v4, %s2967_s11  ;;  %992 = vrot.lane.b32.xlu0 %v2610_v50, %s2967_s11  ;;  %v2611_v4 = vld [vmem:[%s3059_s7 + $0x79] sm:$0xff] }
 0x158   : > { %v3900_v5 = vpop.permute.xlu1 %1012  ;;  %v1011_v7 = vpop.permute.xlu0 %1010 }
 0x15a   : > { %1150 = vrot.lane.b32.xlu1 %v4707_v18, %s2968_s12  ;;  %1118 = vrot.lane.b32.xlu0 %v4708_v39, %s2968_s12 }
 0x15c   : > { %v1139_v1 = vpop.permute.xlu1 %1138  ;;  %v1107_v28 = vpop.permute.xlu0 %1106 }
 0x15e   : > { %1532 = vrot.lane.b32.xlu1 %v4709_v41, %s2971_s14  ;;  %1500 = vrot.lane.b32.xlu0 %v4710_v14, %s2971_s14 }
 0x160   : > { %v3910_v29 = vpop.permute.xlu1 %1140  ;;  %v3912_v20 = vpop.permute.xlu0 %1108 }
 0x162   : > { %1152 = vrot.lane.b32.xlu1 %v4709_v41, %s2968_s12  ;;  %1120 = vrot.lane.b32.xlu0 %v4710_v14, %s2968_s12  ;;  %v4711_v41 = vld [vmem:[#allocation23_spill] sm:$0xff] }
 0x164   : > { %v1267_v56 = vpop.permute.xlu1 %1266  ;;  %v1235_v42 = vpop.permute.xlu0 %1234 }
 0x166   : > { %1278 = vrot.lane.b32.xlu1 %v3465_v38, %s2969_s13  ;;  %1246 = vrot.lane.b32.xlu0 %v3360_v8, %s2969_s13  ;;  %v1587_v38 = vsel %vm1586_vm0, %v268_v24, %v4711_v41  ;;  %v4712_v8 = vld [vmem:[#allocation39_spill] sm:$0xff]  ;;  %v4713_v41 = vld [vmem:[#allocation29_spill] sm:$0xff] }
 0x167   : > { %v1603_v12 = vsel %vm1586_vm0, %v4714_v0, %v4713_v41 }
 0x168   : > { %v3922_v40 = vpop.permute.xlu1 %1268  ;;  %v3924_v50 = vpop.permute.xlu0 %1236 }
 0x16a   : > { %1280 = vrot.lane.b32.xlu1 %v3462_v25, %s2969_s13  ;;  %1248 = vrot.lane.b32.xlu0 %v3357_v63, %s2969_s13  ;;  %v1620_v25 = vsel %vm1619_vm1, %v1587_v38, %v4712_v8  ;;  %v2612_v8 = vld [vmem:[%s3059_s7 + $0x81] sm:$0xff] }
 0x16b   : > { %v1653_v63 = vsel %vm1652_vm3, %v1620_v25, %v3713_v58  ;;  %v1636_v58 = vsel %vm1619_vm1, %v1603_v12, %v3588_v48  ;;  %v269_v12 = vld [vmem:[%s3059_s7 + $0x8] sm:$0xff] }
 0x16c   : > { %v1395_v18 = vpop.permute.xlu1 %1394  ;;  %v1363_v39 = vpop.permute.xlu0 %1362  ;;  %v1686_v24 = vsel %vm1685_vm4, %v1653_v63, %v979_v60  ;;  %v2628_v60 = vld [vmem:[%s3059_s7 + $0x141] sm:$0xff]  ;;  %v1669_v0 = vsel %vm1652_vm3, %v1636_v58, %v3801_v11 }
 0x16d   : > { %v1719_v43 = vsel %vm1718_vm5, %v1686_v24, %v1107_v28  ;;  %v2659_v11 = vld [vmem:[%s3059_s7 + $0x13a] sm:$0xff] }
 0x16e   : > { %1406 = vrot.lane.b32.xlu1 %v2627_v23, %s2970_s26  ;;  %1374 = vrot.lane.b32.xlu0 %v2611_v4, %s2970_s26  ;;  %v1752_v38 = vsel %vm1751_vm6, %v1719_v43, %v1235_v42  ;;  %v2643_v42 = vld [vmem:[%s3059_s7 + $0x7a] sm:$0xff] }
 0x16f   : > { %v1785_v28 = vsel %vm1784_vm7, %v1752_v38, %v1363_v39  ;;  %v4715_v58 = vld [vmem:[#allocation25_spill] sm:$0xff]  ;;  %v4716_v38 = vld [vmem:[#allocation28_spill] sm:$0xff] }
 0x170   : > { %v1365_v14 = vpop.permute.xlu1 %1364  ;;  %v3941_v53 = vpop.permute.xlu0 %1014 }
 0x172   : > { %1026 = vrot.lane.b32.xlu1 %v2627_v23, %s2967_s11  ;;  %994 = vrot.lane.b32.xlu0 %v2611_v4, %s2967_s11  ;;  %v1702_v4 = vsel %vm1685_vm4, %v1669_v0, %v1011_v7  ;;  %v4717_v0 = vld [vmem:[#allocation32_spill] sm:$0xff] }
 0x173   : > { %v1735_v48 = vsel %vm1718_vm5, %v1702_v4, %v1139_v1  ;;  %v1588_v1 = vsel %vm1586_vm0, %v269_v12, %v4715_v58 }
 0x174   : > { %v1491_v25 = vpop.permute.xlu1 %1490  ;;  %v1397_v23 = vpop.permute.xlu0 %1396  ;;  %v1768_v43 = vsel %vm1751_vm6, %v1735_v48, %v1267_v56  ;;  %v4718_v56 = vld [vmem:[#allocation38_spill] sm:$0xff] }
 0x175   : > { %v1818_v63 = vsel %vm1817_vm8, %v1785_v28, %v1491_v25  ;;  %v1801_v39 = vsel %vm1784_vm7, %v1768_v43, %v1395_v18  ;;  %v1604_v28 = vsel %vm1586_vm0, %v4717_v0, %v4716_v38  ;;  %v1621_v25 = vsel %vm1619_vm1, %v1588_v1, %v4718_v56  ;;  %v2582_v38 = vld [vmem:[%s3059_s7 + $0x98] sm:$0xff] }
 0x176   : > { %1408 = vrot.lane.b32.xlu1 %v2628_v60, %s2970_s26  ;;  %1376 = vrot.lane.b32.xlu0 %v2612_v8, %s2970_s26  ;;  %v1637_v18 = vsel %vm1619_vm1, %v1604_v28, %v3586_v51  ;;  %v1654_v4 = vsel %vm1652_vm3, %v1621_v25, %v3711_v37  ;;  %v2629_v56 = vld [vmem:[%s3059_s7 + $0x151] sm:$0xff] }
 0x177   : > { %2757 = vmatprep.mubr.msk.f32.mxu0 %vm1855_vm9, %v1818_v63  ;;  %v1670_v63 = vsel %vm1652_vm3, %v1637_v18, %v3799_v30  ;;  %v1687_v43 = vsel %vm1685_vm4, %v1654_v4, %v3887_v27  ;;  %v2613_v25 = vld [vmem:[%s3059_s7 + $0x91] sm:$0xff] }
 0x178   : > { %v3969_v24 = vpop.permute.xlu1 %1016  ;;  %v1523_v7 = vpop.permute.xlu0 %1522  ;;  %v1720_v51 = vsel %vm1718_vm5, %v1687_v43, %v3912_v20  ;;  %v4720_v43 = vld [vmem:[#allocation26_spill] sm:$0xff] }
 0x179   : > { %v1834_v41 = vsel %vm1817_vm8, %v1801_v39, %v1523_v7  ;;  %v1703_v39 = vsel %vm1685_vm4, %v1670_v63, %v3900_v5  ;;  %v1753_v30 = vsel %vm1751_vm6, %v1720_v51, %v3924_v50  ;;  %v2644_v50 = vld [vmem:[%s3059_s7 + $0x82] sm:$0xff] }
 0x17a   : > { %1534 = vrot.lane.b32.xlu1 %v2659_v11, %s2971_s14  ;;  %1502 = vrot.lane.b32.xlu0 %v2643_v42, %s2971_s14  ;;  %v1736_v7 = vsel %vm1718_vm5, %v1703_v39, %v3910_v29  ;;  %v1786_v27 = vsel %vm1784_vm7, %v1753_v30, %v1365_v14  ;;  %v4719_v63 = vld [vmem:[#allocation22_spill] sm:$0xff]  ;;  %v4721_v39 = vld [vmem:[#allocation31_spill] sm:$0xff] }
 0x17b   : > { %2781 = vmatprep.mubr.msk.f32.mxu1 %vm1855_vm9, %v1834_v41  ;;  %v1769_v37 = vsel %vm1751_vm6, %v1736_v7, %v3922_v40  ;;  %v2660_v40 = vld [vmem:[%s3059_s7 + $0x142] sm:$0xff]  ;;  %v4722_v7 = vld [vmem:[#allocation35_spill] sm:$0xff] }
 0x17c   : > { %v1143_v48 = vpop.permute.xlu1 %1142  ;;  %v1111_v12 = vpop.permute.xlu0 %1110  ;;  %v1802_v5 = vsel %vm1784_vm7, %v1769_v37, %v1397_v23  ;;  %v1605_v51 = vsel %vm1586_vm0, %v4722_v7, %v4721_v39  ;;  %v4727_v39 = vld [vmem:[#allocation34_spill] sm:$0xff] }
 0x17d   : > { %v1638_v30 = vsel %vm1619_vm1, %v1605_v51, %v3596_v10  ;;  %v4728_v51 = vld [vmem:[#allocation40_spill] sm:$0xff] }
 0x17e   : > { %1028 = vrot.lane.b32.xlu1 %v2628_v60, %s2967_s11  ;;  %996 = vrot.lane.b32.xlu0 %v2612_v8, %s2967_s11 }
 0x180   : > { %v1525_v29 = vpop.permute.xlu1 %1524  ;;  %v1493_v41 = vpop.permute.xlu0 %1492 }
 0x181   : > { %v1835_v58 = vsel %vm1817_vm8, %v1802_v5, %v1525_v29  ;;  %v1819_v20 = vsel %vm1817_vm8, %v1786_v27, %v1493_v41  ;;  %v1671_v5 = vsel %vm1652_vm3, %v1638_v30, %v3809_v47  ;;  %v2630_v47 = vld [vmem:[%s3059_s7 + $0x159] sm:$0xff] }
 0x182   : > { %1154 = vrot.lane.b32.xlu1 %v2659_v11, %s2968_s12  ;;  %1122 = vrot.lane.b32.xlu0 %v2643_v42, %s2968_s12  ;;  %v2581_v11 = vld [vmem:[%s3059_s7 + $0x90] sm:$0xff] }
 0x183   : > { %2758 = vmatmul.mubr.msk.f32.vlgmr.msra.gmra.mrb[0].mxu0 %vm1855_vm9, %v1819_v20  ;;  %2782 = vmatmul.mubr.msk.f32.vlgmr.msra.gmra.mrb[0].mxu1 %vm1855_vm9, %v1835_v58  ;;  %v1704_v20 = vsel %vm1685_vm4, %v1671_v5, %v3941_v53 }
 0x184   : > { %v4012_v14 = vpop.permute.xlu1 %1144  ;;  %v4014_v60 = vpop.permute.xlu0 %1112 }
 0x186   : > { %1536 = vrot.lane.b32.xlu1 %v2660_v40, %s2971_s14  ;;  %1504 = vrot.lane.b32.xlu0 %v2644_v50, %s2971_s14 }
 0x188   : > { %v1271_v8 = vpop.permute.xlu1 %1270  ;;  %v1239_v23 = vpop.permute.xlu0 %1238 }
 0x18a   : > { %1156 = vrot.lane.b32.xlu1 %v2660_v40, %s2968_s12  ;;  %1124 = vrot.lane.b32.xlu0 %v2644_v50, %s2968_s12  ;;  %v1737_v40 = vsel %vm1718_vm5, %v1704_v20, %v1143_v48 }
 0x18b   : > { %v1770_v10 = vsel %vm1751_vm6, %v1737_v40, %v1271_v8  ;;  %v2661_v8 = vld [vmem:[%s3059_s7 + $0x152] sm:$0xff] }
 0x18c   : > { %v4021_v42 = vpop.permute.xlu1 %1272  ;;  %v4023_v1 = vpop.permute.xlu0 %1240 }
 0x18e   : > { %1282 = vrot.lane.b32.xlu1 %v3482_v22, %s2969_s13  ;;  %1250 = vrot.lane.b32.xlu0 %v2581_v11, %s2969_s13  ;;  %v1589_v22 = vsel %vm1586_vm0, %v4720_v43, %v4719_v63  ;;  %v2614_v11 = vld [vmem:[%s3059_s7 + $0x99] sm:$0xff]  ;;  %v4725_v63 = vld [vmem:[#allocation27_spill] sm:$0xff] }
 0x190   : > { %v1399_v0 = vpop.permute.xlu1 %1398  ;;  %v1367_v28 = vpop.permute.xlu0 %1366 }
 0x192   : > { %1284 = vrot.lane.b32.xlu1 %v3479_v6, %s2969_s13  ;;  %1252 = vrot.lane.b32.xlu0 %v2582_v38, %s2969_s13  ;;  %v4723_v6 = vld [vmem:[#allocation41_spill] sm:$0xff] }
 0x193   : > { %v1622_v37 = vsel %vm1619_vm1, %v1589_v22, %v4723_v6  ;;  %v4726_v22 = vld [vmem:[#allocation30_spill] sm:$0xff] }
 0x194   : > { %v4034_v18 = vpop.permute.xlu1 %1018  ;;  %v4036_v4 = vpop.permute.xlu0 %986  ;;  %v1655_v27 = vsel %vm1652_vm3, %v1622_v37, %v3721_v17  ;;  %v1606_v7 = vsel %vm1586_vm0, %v4727_v39, %v4726_v22 }
 0x195   : > { %v1688_v58 = vsel %vm1685_vm4, %v1655_v27, %v3895_v16  ;;  %v1803_v16 = vsel %vm1784_vm7, %v1770_v10, %v1399_v0  ;;  %v1639_v37 = vsel %vm1619_vm1, %v1606_v7, %v3594_v35  ;;  %v1706_v39 = vsel %vm1685_vm4, %v3821_v62, %v4034_v18  ;;  %v2616_v62 = vld [vmem:[%s3059_s7 + $0xb1] sm:$0xff] }
 0x196   : > { %1410 = vrot.lane.b32.xlu1 %v2629_v56, %s2970_s26  ;;  %1378 = vrot.lane.b32.xlu0 %v2613_v25, %s2970_s26  ;;  %v1721_v50 = vsel %vm1718_vm5, %v1688_v58, %v1111_v12  ;;  %v1672_v27 = vsel %vm1652_vm3, %v1639_v37, %v3807_v19  ;;  %v1690_v7 = vsel %vm1685_vm4, %v3733_v44, %v4036_v4 }
 0x197   : > { %v1754_v17 = vsel %vm1751_vm6, %v1721_v50, %v1239_v23  ;;  %v2645_v23 = vld [vmem:[%s3059_s7 + $0x92] sm:$0xff]  ;;  %v1705_v40 = vsel %vm1685_vm4, %v1672_v27, %v3969_v24 }
 0x198   : > { %v1401_v29 = vpop.permute.xlu1 %1400  ;;  %v1369_v41 = vpop.permute.xlu0 %1368  ;;  %v1787_v53 = vsel %vm1784_vm7, %v1754_v17, %v1367_v28  ;;  %v4724_v28 = vld [vmem:[#allocation24_spill] sm:$0xff]  ;;  %v1738_v50 = vsel %vm1718_vm5, %v1705_v40, %v4012_v14  ;;  %v2663_v40 = vld [vmem:[%s3059_s7 + $0x16a] sm:$0xff] }
 0x199   : > { %v1590_v43 = vsel %vm1586_vm0, %v4725_v63, %v4724_v28  ;;  %v2615_v28 = vld [vmem:[%s3059_s7 + $0xa9] sm:$0xff]  ;;  %v2632_v27 = vld [vmem:[%s3059_s7 + $0x171] sm:$0xff] }
 0x19a   : > { %1030 = vrot.lane.b32.xlu1 %v2629_v56, %s2967_s11  ;;  %998 = vrot.lane.b32.xlu0 %v2613_v25, %s2967_s11  ;;  %v1623_v6 = vsel %vm1619_vm1, %v1590_v43, %v4728_v51 }
 0x19b   : > { %v1656_v30 = vsel %vm1652_vm3, %v1623_v6, %v3719_v59  ;;  %v1771_v59 = vsel %vm1751_vm6, %v1738_v50, %v4021_v42  ;;  %v2662_v42 = vld [vmem:[%s3059_s7 + $0x15a] sm:$0xff]  ;;  %v2647_v50 = vld [vmem:[%s3059_s7 + $0xaa] sm:$0xff] }
 0x19c   : > { %v1527_v38 = vpop.permute.xlu1 %1526  ;;  %v1495_v48 = vpop.permute.xlu0 %1494  ;;  %v1689_v20 = vsel %vm1685_vm4, %v1656_v30, %v3893_v55  ;;  %v1804_v55 = vsel %vm1784_vm7, %v1771_v59, %v1401_v29 }
 0x19d   : > { %v1836_v12 = vsel %vm1817_vm8, %v1803_v16, %v1527_v38  ;;  %v1820_v56 = vsel %vm1817_vm8, %v1787_v53, %v1495_v48  ;;  %v1722_v35 = vsel %vm1718_vm5, %v1689_v20, %v4014_v60  ;;  %v2583_v16 = vld [vmem:[%s3059_s7 + $0xa8] sm:$0xff]  ;;  %v2600_v48 = vld [vmem:[%s3059_s7 + $0x170] sm:$0xff] }
 0x19e   : > { %1412 = vrot.lane.b32.xlu1 %v2630_v47, %s2970_s26  ;;  %1380 = vrot.lane.b32.xlu0 %v2614_v11, %s2970_s26  ;;  %v1755_v19 = vsel %vm1751_vm6, %v1722_v35, %v4023_v1  ;;  %v2646_v1 = vld [vmem:[%s3059_s7 + $0x9a] sm:$0xff] }
 0x19f   : > { %2760 = vmatprep.mubr.msk.f32.mxu0 %vm1855_vm9, %v1820_v56  ;;  %2784 = vmatprep.mubr.msk.f32.mxu1 %vm1855_vm9, %v1836_v12  ;;  %v1788_v24 = vsel %vm1784_vm7, %v1755_v19, %v1369_v41  ;;  %v2584_v12 = vld [vmem:[%s3059_s7 + $0xb0] sm:$0xff] }
 0x1a0   : > { %v4076_v25 = vpop.permute.xlu1 %1020  ;;  %v4078_v0 = vpop.permute.xlu0 %988 }
 0x1a2   : > { %1538 = vrot.lane.b32.xlu1 %v2661_v8, %s2971_s14  ;;  %1506 = vrot.lane.b32.xlu0 %v2645_v23, %s2971_s14 }
 0x1a4   : > { %v1147_v5 = vpop.permute.xlu1 %1146  ;;  %v1115_v58 = vpop.permute.xlu0 %1114 }
 0x1a5   : > { %v1739_v51 = vsel %vm1718_vm5, %v1706_v39, %v1147_v5  ;;  %v1723_v6 = vsel %vm1718_vm5, %v1690_v7, %v1115_v58  ;;  %v2633_v39 = vld [vmem:[%s3059_s7 + $0x181] sm:$0xff] }
 0x1a6   : > { %1032 = vrot.lane.b32.xlu1 %v2630_v47, %s2967_s11  ;;  %1000 = vrot.lane.b32.xlu0 %v2614_v11, %s2967_s11  ;;  %v2617_v7 = vld [vmem:[%s3059_s7 + $0xc1] sm:$0xff] }
 0x1a8   : > { %v1529_v14 = vpop.permute.xlu1 %1528  ;;  %v1497_v10 = vpop.permute.xlu0 %1496 }
 0x1a9   : > { %v1837_v17 = vsel %vm1817_vm8, %v1804_v55, %v1529_v14  ;;  %v1821_v60 = vsel %vm1817_vm8, %v1788_v24, %v1497_v10  ;;  %v1707_v24 = vsel %vm1685_vm4, %v3817_v57, %v4076_v25  ;;  %v1691_v14 = vsel %vm1685_vm4, %v3729_v3, %v4078_v0 }
 0x1aa   : > { %1158 = vrot.lane.b32.xlu1 %v2661_v8, %s2968_s12  ;;  %1126 = vrot.lane.b32.xlu0 %v2645_v23, %s2968_s12  ;;  %v2631_v23 = vld [vmem:[%s3059_s7 + $0x169] sm:$0xff] }
 0x1ab   : > { %2761 = vmatmul.mubr.msk.f32.gmra.mrb[2].mxu0 %vm1855_vm9, %v1821_v60  ;;  %2785 = vmatmul.mubr.msk.f32.gmra.mrb[2].mxu1 %vm1855_vm9, %v1837_v17 }
 0x1ac   : > { %v1149_v29 = vpop.permute.xlu1 %1148  ;;  %v1117_v41 = vpop.permute.xlu0 %1116 }
 0x1ad   : > { %v1740_v10 = vsel %vm1718_vm5, %v1707_v24, %v1149_v29  ;;  %v1724_v17 = vsel %vm1718_vm5, %v1691_v14, %v1117_v41  ;;  %v2664_v41 = vld [vmem:[%s3059_s7 + $0x172] sm:$0xff] }
 0x1ae   : > { %1540 = vrot.lane.b32.xlu1 %v2662_v42, %s2971_s14  ;;  %1508 = vrot.lane.b32.xlu0 %v2646_v1, %s2971_s14 }
 0x1b0   : > { %v1275_v47 = vpop.permute.xlu1 %1274  ;;  %v1243_v11 = vpop.permute.xlu0 %1242 }
 0x1b1   : > { %v1772_v37 = vsel %vm1751_vm6, %v1739_v51, %v1275_v47  ;;  %v1756_v30 = vsel %vm1751_vm6, %v1723_v6, %v1243_v11  ;;  %v2648_v47 = vld [vmem:[%s3059_s7 + $0xb2] sm:$0xff] }
 0x1b2   : > { %1160 = vrot.lane.b32.xlu1 %v2662_v42, %s2968_s12  ;;  %1128 = vrot.lane.b32.xlu0 %v2646_v1, %s2968_s12 }
 0x1b4   : > { %v1277_v53 = vpop.permute.xlu1 %1276  ;;  %v1245_v38 = vpop.permute.xlu0 %1244 }
 0x1b5   : > { %v1773_v60 = vsel %vm1751_vm6, %v1740_v10, %v1277_v53  ;;  %v1757_v42 = vsel %vm1751_vm6, %v1724_v17, %v1245_v38 }
 0x1b6   : > { %1286 = vrot.lane.b32.xlu1 %v4688_v61, %s2969_s13  ;;  %1254 = vrot.lane.b32.xlu0 %v2583_v16, %s2969_s13 }
 0x1b8   : > { %v1403_v56 = vpop.permute.xlu1 %1402  ;;  %v1371_v8 = vpop.permute.xlu0 %1370 }
 0x1b9   : > { %v1805_v18 = vsel %vm1784_vm7, %v1772_v37, %v1403_v56  ;;  %v1789_v44 = vsel %vm1784_vm7, %v1756_v30, %v1371_v8 }
 0x1ba   : > { %1288 = vrot.lane.b32.xlu1 %v2600_v48, %s2969_s13  ;;  %1256 = vrot.lane.b32.xlu0 %v2584_v12, %s2969_s13  ;;  %v2601_v48 = vld [vmem:[%s3059_s7 + $0x180] sm:$0xff] }
 0x1bb   : > { %v2585_v12 = vld [vmem:[%s3059_s7 + $0xc0] sm:$0xff] }
 0x1bc   : > { %v4134_v63 = vpop.permute.xlu1 %1022  ;;  %v4136_v43 = vpop.permute.xlu0 %990 }
 0x1be   : > { %1414 = vrot.lane.b32.xlu1 %v2631_v23, %s2970_s26  ;;  %1382 = vrot.lane.b32.xlu0 %v2615_v28, %s2970_s26 }
 0x1c0   : > { %v1405_v61 = vpop.permute.xlu1 %1404  ;;  %v1373_v22 = vpop.permute.xlu0 %1372 }
 0x1c1   : > { %v1806_v57 = vsel %vm1784_vm7, %v1773_v60, %v1405_v61  ;;  %v1790_v25 = vsel %vm1784_vm7, %v1757_v42, %v1373_v22 }
 0x1c2   : > { %1034 = vrot.lane.b32.xlu1 %v2631_v23, %s2967_s11  ;;  %1002 = vrot.lane.b32.xlu0 %v2615_v28, %s2967_s11  ;;  %v2602_v23 = vld [vmem:[%s3059_s7 + $0x188] sm:$0xff] }
 0x1c3   : > { %v2586_v28 = vld [vmem:[%s3059_s7 + $0xc8] sm:$0xff] }
 0x1c4   : > { %v1531_v4 = vpop.permute.xlu1 %1530  ;;  %v1499_v5 = vpop.permute.xlu0 %1498 }
 0x1c5   : > { %v1838_v58 = vsel %vm1817_vm8, %v1805_v18, %v1531_v4  ;;  %v1822_v20 = vsel %vm1817_vm8, %v1789_v44, %v1499_v5 }
 0x1c6   : > { %1416 = vrot.lane.b32.xlu1 %v2632_v27, %s2970_s26  ;;  %1384 = vrot.lane.b32.xlu0 %v2616_v62, %s2970_s26 }
 0x1c7   : > { %2763 = vmatprep.mubr.msk.f32.mxu0 %vm1855_vm9, %v1822_v20  ;;  %2787 = vmatprep.mubr.msk.f32.mxu1 %vm1855_vm9, %v1838_v58  ;;  %v2634_v58 = vld [vmem:[%s3059_s7 + $0x189] sm:$0xff] }
 0x1c8   : > { %v4164_v35 = vpop.permute.xlu1 %1024  ;;  %v4166_v59 = vpop.permute.xlu0 %992 }
 0x1c9   : > { %v1709_v60 = vsel %vm1685_vm4, %v3829_v33, %v4164_v35  ;;  %v1693_v42 = vsel %vm1685_vm4, %v3741_v32, %v4166_v59 }
 0x1ca   : > { %1542 = vrot.lane.b32.xlu1 %v2663_v40, %s2971_s14  ;;  %1510 = vrot.lane.b32.xlu0 %v2647_v50, %s2971_s14 }
 0x1cc   : > { %v1151_v19 = vpop.permute.xlu1 %1150  ;;  %v1119_v55 = vpop.permute.xlu0 %1118 }
 0x1ce   : > { %1036 = vrot.lane.b32.xlu1 %v2632_v27, %s2967_s11  ;;  %1004 = vrot.lane.b32.xlu0 %v2616_v62, %s2967_s11  ;;  %v1708_v27 = vsel %vm1685_vm4, %v3833_v52, %v4134_v63  ;;  %v1692_v62 = vsel %vm1685_vm4, %v3745_v54, %v4136_v43  ;;  %v2618_v52 = vld [vmem:[%s3059_s7 + $0xc9] sm:$0xff] }
 0x1cf   : > { %v1741_v18 = vsel %vm1718_vm5, %v1708_v27, %v1151_v19  ;;  %v1725_v44 = vsel %vm1718_vm5, %v1692_v62, %v1119_v55  ;;  %v2665_v19 = vld [vmem:[%s3059_s7 + $0x182] sm:$0xff] }
 0x1d0   : > { %v1533_v1 = vpop.permute.xlu1 %1532  ;;  %v1501_v3 = vpop.permute.xlu0 %1500  ;;  %v2649_v55 = vld [vmem:[%s3059_s7 + $0xc2] sm:$0xff] }
 0x1d1   : > { %v1839_v0 = vsel %vm1817_vm8, %v1806_v57, %v1533_v1  ;;  %v1823_v29 = vsel %vm1817_vm8, %v1790_v25, %v1501_v3  ;;  %v2636_v27 = vld [vmem:[%s3059_s7 + $0x1a1] sm:$0xff] }
 0x1d2   : > { %1162 = vrot.lane.b32.xlu1 %v2663_v40, %s2968_s12  ;;  %1130 = vrot.lane.b32.xlu0 %v2647_v50, %s2968_s12  ;;  %v2620_v62 = vld [vmem:[%s3059_s7 + $0xe1] sm:$0xff] }
 0x1d3   : > { %2764 = vmatmul.mubr.msk.f32.gmra.mrb[4].mxu0 %vm1855_vm9, %v1823_v29  ;;  %2788 = vmatmul.mubr.msk.f32.gmra.mrb[4].mxu1 %vm1855_vm9, %v1839_v0 }
 0x1d4   : > { %v1153_v11 = vpop.permute.xlu1 %1152  ;;  %v1121_v16 = vpop.permute.xlu0 %1120 }
 0x1d5   : > { %v1742_v57 = vsel %vm1718_vm5, %v1709_v60, %v1153_v11  ;;  %v1726_v25 = vsel %vm1718_vm5, %v1693_v42, %v1121_v16 }
 0x1d6   : > { %1544 = vrot.lane.b32.xlu1 %v2664_v41, %s2971_s14  ;;  %1512 = vrot.lane.b32.xlu0 %v2648_v47, %s2971_s14 }
 0x1d8   : > { %v1279_v53 = vpop.permute.xlu1 %1278  ;;  %v1247_v38 = vpop.permute.xlu0 %1246 }
 0x1d9   : > { %v1774_v4 = vsel %vm1751_vm6, %v1741_v18, %v1279_v53  ;;  %v1758_v5 = vsel %vm1751_vm6, %v1725_v44, %v1247_v38 }
 0x1da   : > { %1164 = vrot.lane.b32.xlu1 %v2664_v41, %s2968_s12  ;;  %1132 = vrot.lane.b32.xlu0 %v2648_v47, %s2968_s12  ;;  %v2666_v41 = vld [vmem:[%s3059_s7 + $0x18a] sm:$0xff] }
 0x1db   : > { %v2650_v47 = vld [vmem:[%s3059_s7 + $0xca] sm:$0xff] }
 0x1dc   : > { %v1281_v56 = vpop.permute.xlu1 %1280  ;;  %v1249_v8 = vpop.permute.xlu0 %1248 }
 0x1dd   : > { %v1775_v1 = vsel %vm1751_vm6, %v1742_v57, %v1281_v56  ;;  %v1759_v3 = vsel %vm1751_vm6, %v1726_v25, %v1249_v8 }
 0x1de   : > { %1290 = vrot.lane.b32.xlu1 %v2601_v48, %s2969_s13  ;;  %1258 = vrot.lane.b32.xlu0 %v2585_v12, %s2969_s13  ;;  %v2603_v48 = vld [vmem:[%s3059_s7 + $0x198] sm:$0xff] }
 0x1df   : > { %v2587_v12 = vld [vmem:[%s3059_s7 + $0xd8] sm:$0xff] }
 0x1e0   : > { %v1407_v61 = vpop.permute.xlu1 %1406  ;;  %v1375_v22 = vpop.permute.xlu0 %1374 }
 0x1e1   : > { %v1807_v63 = vsel %vm1784_vm7, %v1774_v4, %v1407_v61  ;;  %v1791_v54 = vsel %vm1784_vm7, %v1758_v5, %v1375_v22 }
 0x1e2   : > { %1292 = vrot.lane.b32.xlu1 %v2602_v23, %s2969_s13  ;;  %1260 = vrot.lane.b32.xlu0 %v2586_v28, %s2969_s13  ;;  %v2604_v23 = vld [vmem:[%s3059_s7 + $0x1a0] sm:$0xff] }
 0x1e3   : > { %v2588_v28 = vld [vmem:[%s3059_s7 + $0xe0] sm:$0xff] }
 0x1e4   : > { %v4206_v51 = vpop.permute.xlu1 %1026  ;;  %v4208_v6 = vpop.permute.xlu0 %994 }
 0x1e5   : > { %v1710_v4 = vsel %vm1685_vm4, %v3845_v2, %v4206_v51  ;;  %v1694_v5 = vsel %vm1685_vm4, %v3757_v36, %v4208_v6  ;;  %v2651_v2 = vld [vmem:[%s3059_s7 + $0xda] sm:$0xff] }
 0x1e6   : > { %1418 = vrot.lane.b32.xlu1 %v2633_v39, %s2970_s26  ;;  %1386 = vrot.lane.b32.xlu0 %v2617_v7, %s2970_s26 }
 0x1e8   : > { %v1409_v37 = vpop.permute.xlu1 %1408  ;;  %v1377_v30 = vpop.permute.xlu0 %1376 }
 0x1e9   : > { %v1808_v33 = vsel %vm1784_vm7, %v1775_v1, %v1409_v37  ;;  %v1792_v35 = vsel %vm1784_vm7, %v1759_v3, %v1377_v30 }
 0x1ea   : > { %1038 = vrot.lane.b32.xlu1 %v2633_v39, %s2967_s11  ;;  %1006 = vrot.lane.b32.xlu0 %v2617_v7, %s2967_s11  ;;  %v2635_v39 = vld [vmem:[%s3059_s7 + $0x199] sm:$0xff] }
 0x1eb   : > { %v2619_v7 = vld [vmem:[%s3059_s7 + $0xd9] sm:$0xff] }
 0x1ec   : > { %v1535_v43 = vpop.permute.xlu1 %1534  ;;  %v1503_v20 = vpop.permute.xlu0 %1502 }
 0x1ed   : > { %v1840_v40 = vsel %vm1817_vm8, %v1807_v63, %v1535_v43  ;;  %v1824_v50 = vsel %vm1817_vm8, %v1791_v54, %v1503_v20  ;;  %v2667_v43 = vld [vmem:[%s3059_s7 + $0x19a] sm:$0xff] }
 0x1ee   : > { %1420 = vrot.lane.b32.xlu1 %v2634_v58, %s2970_s26  ;;  %1388 = vrot.lane.b32.xlu0 %v2618_v52, %s2970_s26 }
 0x1ef   : > { %2766 = vmatprep.mubr.msk.f32.mxu0 %vm1855_vm9, %v1824_v50  ;;  %2790 = vmatprep.mubr.msk.f32.mxu1 %vm1855_vm9, %v1840_v40 }
 0x1f0   : > { %v4236_v24 = vpop.permute.xlu1 %1028  ;;  %v4238_v14 = vpop.permute.xlu0 %996 }
 0x1f1   : > { %v1711_v57 = vsel %vm1685_vm4, %v3841_v13, %v4236_v24  ;;  %v1695_v25 = vsel %vm1685_vm4, %v3753_v31, %v4238_v14 }
 0x1f2   : > { %1546 = vrot.lane.b32.xlu1 %v2665_v19, %s2971_s14  ;;  %1514 = vrot.lane.b32.xlu0 %v2649_v55, %s2971_s14 }
 0x1f4   : > { %v1155_v10 = vpop.permute.xlu1 %1154  ;;  %v1123_v17 = vpop.permute.xlu0 %1122 }
 0x1f6   : > { %1040 = vrot.lane.b32.xlu1 %v2634_v58, %s2967_s11  ;;  %1008 = vrot.lane.b32.xlu0 %v2618_v52, %s2967_s11  ;;  %v1743_v58 = vsel %vm1718_vm5, %v1710_v4, %v1155_v10  ;;  %v1727_v52 = vsel %vm1718_vm5, %v1694_v5, %v1123_v17 }
 0x1f8   : > { %v1537_v0 = vpop.permute.xlu1 %1536  ;;  %v1505_v32 = vpop.permute.xlu0 %1504 }
 0x1f9   : > { %v1841_v59 = vsel %vm1817_vm8, %v1808_v33, %v1537_v0  ;;  %v1825_v29 = vsel %vm1817_vm8, %v1792_v35, %v1505_v32 }
 0x1fa   : > { %1166 = vrot.lane.b32.xlu1 %v2665_v19, %s2968_s12  ;;  %1134 = vrot.lane.b32.xlu0 %v2649_v55, %s2968_s12  ;;  %v2668_v19 = vld [vmem:[%s3059_s7 + $0x1a2] sm:$0xff] }
 0x1fb   : > { %2767 = vmatmul.mubr.msk.f32.gmra.mrb[6].mxu0 %vm1855_vm9, %v1825_v29  ;;  %2791 = vmatmul.mubr.msk.f32.gmra.mrb[6].mxu1 %vm1855_vm9, %v1841_v59  ;;  %v2652_v55 = vld [vmem:[%s3059_s7 + $0xe2] sm:$0xff]  ;;  %s246_s7 = sand.u32 1, %s2946_s16  }
 0x1fc   : > { %v1157_v11 = vpop.permute.xlu1 %1156  ;;  %v1125_v16 = vpop.permute.xlu0 %1124  ;;  %s2475_s22 = sshll.u32 %s246_s7, 8 }
 0x1fd   : > { %v1744_v1 = vsel %vm1718_vm5, %v1711_v57, %v1157_v11  ;;  %v1728_v3 = vsel %vm1718_vm5, %v1695_v25, %v1125_v16  ;;  %v4375_v57 = vld [vmem:[%s4604_s3] ss:$0 sm:$0xff]  ;;  %s4391_s24 = scalar_lea.vmem [#allocation2], %s2475_s22 }
 0x1fe   : > { %1548 = vrot.lane.b32.xlu1 %v2666_v41, %s2971_s14  ;;  %1516 = vrot.lane.b32.xlu0 %v2650_v47, %s2971_s14  ;;  %s2341_s29 = sshll.u32 %s4391_s24, 4  ;;  %s4546_s29 = int_to_ptr.vmem [resolvable:$true] %s2341_s29 }
 0x1ff   : > { %s2884_s8 = scalar_lea.vmem %s4546_s29, 4096 }
 0x200   : > { %v1283_v53 = vpop.permute.xlu1 %1282  ;;  %v1251_v38 = vpop.permute.xlu0 %1250  ;;  %p2885_p12 = scmp.ne.s32.totalorder %s4546_s29, %s2884_s8 }
 0x201   : > { %v1776_v63 = vsel %vm1751_vm6, %v1743_v58, %v1283_v53  ;;  %v1760_v54 = vsel %vm1751_vm6, %v1727_v52, %v1251_v38 }
 0x202   : > { %1168 = vrot.lane.b32.xlu1 %v2666_v41, %s2968_s12  ;;  %1136 = vrot.lane.b32.xlu0 %v2650_v47, %s2968_s12  ;;  %p2886_p13 = pnand %p2885_p12, %p3039_p4 }
 0x204   : > { %v1285_v56 = vpop.permute.xlu1 %1284  ;;  %v1253_v8 = vpop.permute.xlu0 %1252  ;;  %p2887_p0 = pneg %p2886_p13 }
 0x205   : > { %v1777_v33 = vsel %vm1751_vm6, %v1744_v1, %v1285_v56  ;;  %v1761_v35 = vsel %vm1751_vm6, %v1728_v3, %v1253_v8 }
 0x206   : > { %1294 = vrot.lane.b32.xlu1 %v2603_v48, %s2969_s13  ;;  %1262 = vrot.lane.b32.xlu0 %v2587_v12, %s2969_s13 }
 0x208   : > { %v1411_v61 = vpop.permute.xlu1 %1410  ;;  %v1379_v22 = vpop.permute.xlu0 %1378 }
 0x209   : > { %v1809_v51 = vsel %vm1784_vm7, %v1776_v63, %v1411_v61  ;;  %v1793_v36 = vsel %vm1784_vm7, %v1760_v54, %v1379_v22 }
 0x20a   : > { %1296 = vrot.lane.b32.xlu1 %v2604_v23, %s2969_s13  ;;  %1264 = vrot.lane.b32.xlu0 %v2588_v28, %s2969_s13 }
 0x20c   : > { %v4278_v37 = vpop.permute.xlu1 %1030  ;;  %v4280_v30 = vpop.permute.xlu0 %998 }
 0x20d   : > { %v1712_v23 = vsel %vm1685_vm4, %v3857_v21, %v4278_v37  ;;  %v1696_v28 = vsel %vm1685_vm4, %v3769_v9, %v4280_v30 }
 0x20e   : > { %1422 = vrot.lane.b32.xlu1 %v2635_v39, %s2970_s26  ;;  %1390 = vrot.lane.b32.xlu0 %v2619_v7, %s2970_s26 }
 0x210   : > { %v1413_v18 = vpop.permute.xlu1 %1412  ;;  %v1381_v44 = vpop.permute.xlu0 %1380 }
 0x211   : > { %v1810_v0 = vsel %vm1784_vm7, %v1777_v33, %v1413_v18  ;;  %v1794_v32 = vsel %vm1784_vm7, %v1761_v35, %v1381_v44 }
 0x212   : > { %1424 = vrot.lane.b32.xlu1 %v2636_v27, %s2970_s26  ;;  %1392 = vrot.lane.b32.xlu0 %v2620_v62, %s2970_s26  ;;  %s2709_s26 = sshll.u32 %s2954_s18, 12  ;;  %s4554_s18 = scalar_lea.sflag [#allocation3], %s246_s7 }
 0x213   : > { %s4544_s6 = scalar_lea.hbm %s4605_s4, %s2709_s26 }
 0x214   : > { %v1539_v6 = vpop.permute.xlu1 %1538  ;;  %v1507_v20 = vpop.permute.xlu0 %1506 }
 0x215   : > { %v1842_v40 = vsel %vm1817_vm8, %v1809_v51, %v1539_v6  ;;  %v1826_v50 = vsel %vm1817_vm8, %v1793_v36, %v1507_v20 }
 0x216   : > { %1550 = vrot.lane.b32.xlu1 %v2667_v43, %s2971_s14  ;;  %1518 = vrot.lane.b32.xlu0 %v2651_v2, %s2971_s14 }
 0x217   : > { %2769 = vmatprep.mubr.msk.f32.mxu0 %vm1855_vm9, %v1826_v50  ;;  %2793 = vmatprep.mubr.msk.f32.mxu1 %vm1855_vm9, %v1842_v40 }
 0x218   : > { %v1033_v10 = vpop.permute.xlu1 %1032  ;;  %v1001_v17 = vpop.permute.xlu0 %1000 }
 0x219   : > { %v1713_v58 = vsel %vm1685_vm4, %v3853_v46, %v1033_v10  ;;  %v1697_v52 = vsel %vm1685_vm4, %v3765_v15, %v1001_v17 }
 0x21a   : > { %1552 = vrot.lane.b32.xlu1 %v2668_v19, %s2971_s14  ;;  %1520 = vrot.lane.b32.xlu0 %v2652_v55, %s2971_s14  ;;  %s2888_s14 = sshll.u32 %s2972_s10, 4  ;;  %s2889_s14 = int_to_ptr.vmem [resolvable:$false] %s2888_s14 }
 0x21b   : > { %s2890_s11 = scalar_lea.vmem %s2889_s14, 8192  ;;  %p2891_p1 = scmp.lt.s32.totalorder %s4546_s29, %s2889_s14 }
 0x21c   : > { %v1159_v60 = vpop.permute.xlu1 %1158  ;;  %v1127_v42 = vpop.permute.xlu0 %1126  ;;  %p2892_p2 = scmp.lt.s32.totalorder %s2890_s11, %s2884_s8 }
 0x21d   : > { %v1745_v61 = vsel %vm1718_vm5, %v1712_v23, %v1159_v60  ;;  %v1729_v22 = vsel %vm1718_vm5, %v1696_v28, %v1127_v42  ;;  %v4370_v60 = vld [vmem:[%s4603_s2] ss:$0 sm:$0xff] }
 0x21e   : > { %p2893_p3 = por %p2892_p2, %p2891_p1 }
 0x220   : > { %v1541_v59 = vpop.permute.xlu1 %1540  ;;  %v1509_v29 = vpop.permute.xlu0 %1508  ;;  %p2894_p5 = pnand %p2893_p3, %p2887_p0 }
 0x221   : > { %v1843_v13 = vsel %vm1817_vm8, %v1810_v0, %v1541_v59  ;;  %v1827_v24 = vsel %vm1817_vm8, %v1794_v32, %v1509_v29 }
 0x222   : > { %2770 = vmatmul.mubr.msk.f32.gmra.mrb[8].mxu0 %vm1855_vm9, %v1827_v24  ;;  %2794 = vmatmul.mubr.msk.f32.gmra.mrb[8].mxu1 %vm1855_vm9, %v1843_v13 }
 0x224   : > { %v1161_v31 = vpop.permute.xlu1 %1160  ;;  %v1129_v14 = vpop.permute.xlu0 %1128 }
 0x225   : > { %v1746_v63 = vsel %vm1718_vm5, %v1713_v58, %v1161_v31  ;;  %v1730_v54 = vsel %vm1718_vm5, %v1697_v52, %v1129_v14 }
 0x228   : > { %v1287_v41 = vpop.permute.xlu1 %1286  ;;  %v1255_v47 = vpop.permute.xlu0 %1254 }
 0x229   : > { %v1778_v39 = vsel %vm1751_vm6, %v1745_v61, %v1287_v41  ;;  %v1762_v7 = vsel %vm1751_vm6, %v1729_v22, %v1255_v47 }
 0x22c   : > { %v1289_v11 = vpop.permute.xlu1 %1288  ;;  %v1257_v16 = vpop.permute.xlu0 %1256 }
 0x22d   : > { %v1779_v43 = vsel %vm1751_vm6, %v1746_v63, %v1289_v11  ;;  %v1763_v2 = vsel %vm1751_vm6, %v1730_v54, %v1257_v16 }
 0x230   : > { %v1415_v53 = vpop.permute.xlu1 %1414  ;;  %v1383_v38 = vpop.permute.xlu0 %1382 }
 0x231   : > { %v1811_v27 = vsel %vm1784_vm7, %v1778_v39, %v1415_v53  ;;  %v1795_v62 = vsel %vm1784_vm7, %v1762_v7, %v1383_v38 }
 0x234   : > { %v4328_v48 = vpop.permute.xlu1 %1034  ;;  %v4330_v12 = vpop.permute.xlu0 %1002 }
 0x235   : > { %v1714_v23 = vsel %vm1685_vm4, %v3870_v34, %v4328_v48  ;;  %v1698_v28 = vsel %vm1685_vm4, %v3781_v26, %v4330_v12 }
 0x238   : > { %v1417_v56 = vpop.permute.xlu1 %1416  ;;  %v1385_v8 = vpop.permute.xlu0 %1384 }
 0x239   : > { %v1812_v51 = vsel %vm1784_vm7, %v1779_v43, %v1417_v56  ;;  %v1796_v36 = vsel %vm1784_vm7, %v1763_v2, %v1385_v8 }
 0x23c   : > { %v1543_v18 = vpop.permute.xlu1 %1542  ;;  %v1511_v44 = vpop.permute.xlu0 %1510 }
 0x23d   : > { %v1844_v21 = vsel %vm1817_vm8, %v1811_v27, %v1543_v18  ;;  %v1828_v37 = vsel %vm1817_vm8, %v1795_v62, %v1511_v44 }
 0x23e   : > { %2772 = vmatprep.mubr.msk.f32.mxu0 %vm1855_vm9, %v1828_v37  ;;  %2796 = vmatprep.mubr.msk.f32.mxu1 %vm1855_vm9, %v1844_v21 }
 0x240   : > { %v4348_v9 = vpop.permute.xlu1 %1036  ;;  %v4350_v30 = vpop.permute.xlu0 %1004 }
 0x244   : > { %v1163_v4 = vpop.permute.xlu1 %1162  ;;  %v1131_v5 = vpop.permute.xlu0 %1130 }
 0x245   : > { %v1747_v61 = vsel %vm1718_vm5, %v1714_v23, %v1163_v4  ;;  %v1731_v22 = vsel %vm1718_vm5, %v1698_v28, %v1131_v5  ;;  %v1715_v4 = vsel %vm1685_vm4, %v3866_v45, %v4348_v9  ;;  %v1699_v5 = vsel %vm1685_vm4, %v3777_v49, %v4350_v30 }
 0x248   : > { %v1545_v6 = vpop.permute.xlu1 %1544  ;;  %v1513_v20 = vpop.permute.xlu0 %1512 }
 0x249   : > { %v1845_v46 = vsel %vm1817_vm8, %v1812_v51, %v1545_v6  ;;  %v1829_v15 = vsel %vm1817_vm8, %v1796_v36, %v1513_v20 }
 0x24a   : > { %2773 = vmatmul.mubr.msk.f32.gmra.mrb[10].mxu0 %vm1855_vm9, %v1829_v15  ;;  %2797 = vmatmul.mubr.msk.f32.gmra.mrb[10].mxu1 %vm1855_vm9, %v1845_v46 }
 0x24c   : > { %v1165_v40 = vpop.permute.xlu1 %1164  ;;  %v1133_v50 = vpop.permute.xlu0 %1132 }
 0x24d   : > { %v1748_v58 = vsel %vm1718_vm5, %v1715_v4, %v1165_v40  ;;  %v1732_v52 = vsel %vm1718_vm5, %v1699_v5, %v1133_v50 }
 0x250   : > { %v1291_v19 = vpop.permute.xlu1 %1290  ;;  %v1259_v55 = vpop.permute.xlu0 %1258 }
 0x251   : > { %v1780_v39 = vsel %vm1751_vm6, %v1747_v61, %v1291_v19  ;;  %v1764_v7 = vsel %vm1751_vm6, %v1731_v22, %v1259_v55 }
 0x254   : > { %v1293_v10 = vpop.permute.xlu1 %1292  ;;  %v1261_v17 = vpop.permute.xlu0 %1260 }
 0x255   : > { %v1781_v63 = vsel %vm1751_vm6, %v1748_v58, %v1293_v10  ;;  %v1765_v54 = vsel %vm1751_vm6, %v1732_v52, %v1261_v17 }
 0x256   : > { %v2759_v42 = vpop.f32.mrb[0].mxu0  ;;  %v2783_v25 = vpop.f32.mrb[0].mxu1 }
 0x257   : > { %v2189_v1 = vmul.f32 %v2759_v42, %v4370_v60  ;;  %v2205_v3 = vmul.f32 %v2783_v25, %v4370_v60  ;;  %v2022_v33 = vpop.f32.mrb[1].mxu0  ;;  %v2102_v35 = vpop.f32.mrb[1].mxu1 }
 0x258   : > { %v2188_v0 = vmul.f32 %v4370_v60, %v2022_v33  ;;  %v2204_v32 = vmul.f32 %v4370_v60, %v2102_v35  ;;  %v1419_v59 = vpop.permute.xlu1 %1418  ;;  %v1387_v29 = vpop.permute.xlu0 %1386 }
 0x259   : > { %v2228_v13 = vadd.f32 %v4375_v57, %v2189_v1  ;;  %v2244_v24 = vadd.f32 %v4375_v57, %v2205_v3  ;;  %v1813_v27 = vsel %vm1784_vm7, %v1780_v39, %v1419_v59  ;;  %v1797_v62 = vsel %vm1784_vm7, %v1764_v7, %v1387_v29  ;;  %v4731_v7 = vld [vmem:[#allocation37_spill] sm:$0xff] }
 0x25a   : > { %v2227_v31 = vadd.f32 %v4375_v57, %v2188_v0  ;;  %v2243_v14 = vadd.f32 %v4375_v57, %v2204_v32 }
 0x25b   : > { %v2260_v41 = vmax.f32 %v2228_v13, 0.0  ;;  %v2276_v47 = vmax.f32 %v2244_v24, 0.0 }
 0x25c   : > { %v2259_v11 = vmax.f32 %v2227_v31, 0.0  ;;  %v2275_v16 = vmax.f32 %v2243_v14, 0.0  ;;  %v4387_v53 = vpop.permute.xlu1 %1038  ;;  %v4389_v38 = vpop.permute.xlu0 %1006 }
 0x25d   : > { %2292 = vst [vmem:[%s4391_s24 + $0x8] sm:$0xff] %v2260_v41  ;;  %2308 = vst [vmem:[%s4391_s24 + $0x88] sm:$0xff] %v2276_v47  ;;  %v4729_v41 = vld [vmem:[#allocation17_spill] sm:$0xff] }
 0x25e   : > { %2291 = vst [vmem:[%s4391_s24] sm:$0xff] %v2259_v11  ;;  %2307 = vst [vmem:[%s4391_s24 + $0x80] sm:$0xff] %v2275_v16  ;;  %v1716_v47 = vsel %vm1685_vm4, %v4729_v41, %v4387_v53  ;;  %v4730_v11 = vld [vmem:[#allocation42_spill] sm:$0xff] }
 0x25f   : > { %v1700_v16 = vsel %vm1685_vm4, %v4730_v11, %v4389_v38 }
 0x260   : > { %v1421_v56 = vpop.permute.xlu1 %1420  ;;  %v1389_v8 = vpop.permute.xlu0 %1388 }
 0x261   : > { %v1814_v43 = vsel %vm1784_vm7, %v1781_v63, %v1421_v56  ;;  %v1798_v2 = vsel %vm1784_vm7, %v1765_v54, %v1389_v8 }
 0x264   : > { %v1547_v18 = vpop.permute.xlu1 %1546  ;;  %v1515_v44 = vpop.permute.xlu0 %1514 }
 0x265   : > { %v1846_v34 = vsel %vm1817_vm8, %v1813_v27, %v1547_v18  ;;  %v1830_v48 = vsel %vm1817_vm8, %v1797_v62, %v1515_v44  ;;  %v4732_v27 = vld [vmem:[#allocation36_spill] sm:$0xff] }
 0x266   : > { %2775 = vmatprep.mubr.msk.f32.mxu0 %vm1855_vm9, %v1830_v48  ;;  %2799 = vmatprep.mubr.msk.f32.mxu1 %vm1855_vm9, %v1846_v34 }
 0x268   : > { %v1041_v26 = vpop.permute.xlu1 %1040  ;;  %v1009_v12 = vpop.permute.xlu0 %1008 }
 0x269   : > { %v1717_v38 = vsel %vm1685_vm4, %v4731_v7, %v1041_v26  ;;  %v1701_v62 = vsel %vm1685_vm4, %v4732_v27, %v1009_v12 }
 0x26c   : > { %v1167_v21 = vpop.permute.xlu1 %1166  ;;  %v1135_v37 = vpop.permute.xlu0 %1134 }
 0x26d   : > { %v1749_v56 = vsel %vm1718_vm5, %v1716_v47, %v1167_v21  ;;  %v1733_v8 = vsel %vm1718_vm5, %v1700_v16, %v1135_v37 }
 0x270   : > { %v1549_v51 = vpop.permute.xlu1 %1548  ;;  %v1517_v36 = vpop.permute.xlu0 %1516 }
 0x271   : > { %v1847_v45 = vsel %vm1817_vm8, %v1814_v43, %v1549_v51  ;;  %v1831_v9 = vsel %vm1817_vm8, %v1798_v2, %v1517_v36 }
 0x272   : > { %2776 = vmatmul.mubr.msk.f32.gmra.mrb[12].mxu0 %vm1855_vm9, %v1831_v9  ;;  %2800 = vmatmul.mubr.msk.f32.gmra.mrb[12].mxu1 %vm1855_vm9, %v1847_v45 }
 0x274   : > { %v1169_v49 = vpop.permute.xlu1 %1168  ;;  %v1137_v30 = vpop.permute.xlu0 %1136 }
 0x275   : > { %v1750_v34 = vsel %vm1718_vm5, %v1717_v38, %v1169_v49  ;;  %v1734_v48 = vsel %vm1718_vm5, %v1701_v62, %v1137_v30 }
 0x278   : > { %v1295_v6 = vpop.permute.xlu1 %1294  ;;  %v1263_v20 = vpop.permute.xlu0 %1262 }
 0x279   : > { %v1782_v23 = vsel %vm1751_vm6, %v1749_v56, %v1295_v6  ;;  %v1766_v28 = vsel %vm1751_vm6, %v1733_v8, %v1263_v20 }
 0x27c   : > { %v1297_v46 = vpop.permute.xlu1 %1296  ;;  %v1265_v15 = vpop.permute.xlu0 %1264 }
 0x27d   : > { %v1783_v21 = vsel %vm1751_vm6, %v1750_v34, %v1297_v46  ;;  %v1767_v37 = vsel %vm1751_vm6, %v1734_v48, %v1265_v15 }
 0x27e   : > { %v2762_v40 = vpop.f32.mrb[2].mxu0  ;;  %v2786_v50 = vpop.f32.mrb[2].mxu1 }
 0x27f   : > { %v2191_v19 = vmul.f32 %v2762_v40, %v4370_v60  ;;  %v2207_v55 = vmul.f32 %v2786_v50, %v4370_v60  ;;  %v2032_v10 = vpop.f32.mrb[3].mxu0  ;;  %v2112_v17 = vpop.f32.mrb[3].mxu1 }
 0x280   : > { %v2190_v42 = vmul.f32 %v4370_v60, %v2032_v10  ;;  %v2206_v25 = vmul.f32 %v4370_v60, %v2112_v17  ;;  %v1423_v1 = vpop.permute.xlu1 %1422  ;;  %v1391_v3 = vpop.permute.xlu0 %1390 }
 0x281   : > { %v2230_v33 = vadd.f32 %v4375_v57, %v2191_v19  ;;  %v2246_v35 = vadd.f32 %v4375_v57, %v2207_v55  ;;  %v1815_v61 = vsel %vm1784_vm7, %v1782_v23, %v1423_v1  ;;  %v1799_v53 = vsel %vm1784_vm7, %v1766_v28, %v1391_v3 }
 0x282   : > { %v2229_v0 = vadd.f32 %v4375_v57, %v2190_v42  ;;  %v2245_v32 = vadd.f32 %v4375_v57, %v2206_v25 }
 0x283   : > { %v2262_v59 = vmax.f32 %v2230_v33, 0.0  ;;  %v2278_v29 = vmax.f32 %v2246_v35, 0.0 }
 0x284   : > { %v2261_v13 = vmax.f32 %v2229_v0, 0.0  ;;  %v2277_v24 = vmax.f32 %v2245_v32, 0.0  ;;  %v1425_v31 = vpop.permute.xlu1 %1424  ;;  %v1393_v14 = vpop.permute.xlu0 %1392 }
 0x285   : > { %2294 = vst [vmem:[%s4391_s24 + $0x18] sm:$0xff] %v2262_v59  ;;  %2310 = vst [vmem:[%s4391_s24 + $0x98] sm:$0xff] %v2278_v29  ;;  %v1816_v26 = vsel %vm1784_vm7, %v1783_v21, %v1425_v31  ;;  %v1800_v12 = vsel %vm1784_vm7, %v1767_v37, %v1393_v14 }
 0x286   : > { %2293 = vst [vmem:[%s4391_s24 + $0x10] sm:$0xff] %v2261_v13  ;;  %2309 = vst [vmem:[%s4391_s24 + $0x90] sm:$0xff] %v2277_v24 }
 0x288   : > { %v1551_v22 = vpop.permute.xlu1 %1550  ;;  %v1519_v39 = vpop.permute.xlu0 %1518 }
 0x289   : > { %v1848_v18 = vsel %vm1817_vm8, %v1815_v61, %v1551_v22  ;;  %v1832_v44 = vsel %vm1817_vm8, %v1799_v53, %v1519_v39 }
 0x28a   : > { %2778 = vmatprep.mubr.msk.f32.mxu0 %vm1855_vm9, %v1832_v44  ;;  %2802 = vmatprep.mubr.msk.f32.mxu1 %vm1855_vm9, %v1848_v18 }
 0x28c   : > { %v1553_v4 = vpop.permute.xlu1 %1552  ;;  %v1521_v5 = vpop.permute.xlu0 %1520 }
 0x28d   : > { %v1849_v58 = vsel %vm1817_vm8, %v1816_v26, %v1553_v4  ;;  %v1833_v52 = vsel %vm1817_vm8, %v1800_v12, %v1521_v5 }
 0x28e   : > { %2779 = vmatmul.mubr.msk.f32.gmra.mrb[14].mxu0 %vm1855_vm9, %v1833_v52  ;;  %2803 = vmatmul.mubr.msk.f32.gmra.mrb[14].mxu1 %vm1855_vm9, %v1849_v58 }
 0x2a6   : > { %v2765_v63 = vpop.f32.mrb[4].mxu0  ;;  %v2789_v54 = vpop.f32.mrb[4].mxu1 }
 0x2a7   : > { %v2193_v43 = vmul.f32 %v2765_v63, %v4370_v60  ;;  %v2209_v2 = vmul.f32 %v2789_v54, %v4370_v60  ;;  %v2042_v51 = vpop.f32.mrb[5].mxu0  ;;  %v2122_v36 = vpop.f32.mrb[5].mxu1 }
 0x2a8   : > { %v2192_v45 = vmul.f32 %v4370_v60, %v2042_v51  ;;  %v2208_v9 = vmul.f32 %v4370_v60, %v2122_v36 }
 0x2a9   : > { %v2232_v49 = vadd.f32 %v4375_v57, %v2193_v43  ;;  %v2248_v30 = vadd.f32 %v4375_v57, %v2209_v2 }
 0x2aa   : > { %v2231_v6 = vadd.f32 %v4375_v57, %v2192_v45  ;;  %v2247_v20 = vadd.f32 %v4375_v57, %v2208_v9 }
 0x2ab   : > { %v2264_v46 = vmax.f32 %v2232_v49, 0.0  ;;  %v2280_v15 = vmax.f32 %v2248_v30, 0.0 }
 0x2ac   : > { %v2263_v40 = vmax.f32 %v2231_v6, 0.0  ;;  %v2279_v50 = vmax.f32 %v2247_v20, 0.0 }
 0x2ad   : > { %2296 = vst [vmem:[%s4391_s24 + $0x28] sm:$0xff] %v2264_v46  ;;  %2312 = vst [vmem:[%s4391_s24 + $0xa8] sm:$0xff] %v2280_v15 }
 0x2ae   : > { %2295 = vst [vmem:[%s4391_s24 + $0x20] sm:$0xff] %v2263_v40  ;;  %2311 = vst [vmem:[%s4391_s24 + $0xa0] sm:$0xff] %v2279_v50 }
 0x2ce   : > { %v2768_v19 = vpop.f32.mrb[6].mxu0  ;;  %v2792_v55 = vpop.f32.mrb[6].mxu1 }
 0x2cf   : > { %v2195_v10 = vmul.f32 %v2768_v19, %v4370_v60  ;;  %v2211_v17 = vmul.f32 %v2792_v55, %v4370_v60  ;;  %v2052_v42 = vpop.f32.mrb[7].mxu0  ;;  %v2132_v25 = vpop.f32.mrb[7].mxu1 }
 0x2d0   : > { %v2194_v1 = vmul.f32 %v4370_v60, %v2052_v42  ;;  %v2210_v3 = vmul.f32 %v4370_v60, %v2132_v25 }
 0x2d1   : > { %v2234_v33 = vadd.f32 %v4375_v57, %v2195_v10  ;;  %v2250_v35 = vadd.f32 %v4375_v57, %v2211_v17 }
 0x2d2   : > { %v2233_v0 = vadd.f32 %v4375_v57, %v2194_v1  ;;  %v2249_v32 = vadd.f32 %v4375_v57, %v2210_v3 }
 0x2d3   : > { %v2266_v59 = vmax.f32 %v2234_v33, 0.0  ;;  %v2282_v29 = vmax.f32 %v2250_v35, 0.0 }
 0x2d4   : > { %v2265_v13 = vmax.f32 %v2233_v0, 0.0  ;;  %v2281_v24 = vmax.f32 %v2249_v32, 0.0 }
 0x2d5   : > { %2298 = vst [vmem:[%s4391_s24 + $0x38] sm:$0xff] %v2266_v59  ;;  %2314 = vst [vmem:[%s4391_s24 + $0xb8] sm:$0xff] %v2282_v29 }
 0x2d6   : > { %2297 = vst [vmem:[%s4391_s24 + $0x30] sm:$0xff] %v2265_v13  ;;  %2313 = vst [vmem:[%s4391_s24 + $0xb0] sm:$0xff] %v2281_v24 }
 0x2f5   : > { %v2771_v31 = vpop.f32.mrb[8].mxu0  ;;  %v2795_v14 = vpop.f32.mrb[8].mxu1 }
 0x2f6   : > { %v2197_v41 = vmul.f32 %v2771_v31, %v4370_v60  ;;  %v2213_v47 = vmul.f32 %v2795_v14, %v4370_v60  ;;  %v2062_v11 = vpop.f32.mrb[9].mxu0  ;;  %v2142_v16 = vpop.f32.mrb[9].mxu1 }
 0x2f7   : > { %v2196_v56 = vmul.f32 %v4370_v60, %v2062_v11  ;;  %v2212_v8 = vmul.f32 %v4370_v60, %v2142_v16 }
 0x2f8   : > { %v2236_v23 = vadd.f32 %v4375_v57, %v2197_v41  ;;  %v2252_v28 = vadd.f32 %v4375_v57, %v2213_v47 }
 0x2f9   : > { %v2235_v61 = vadd.f32 %v4375_v57, %v2196_v56  ;;  %v2251_v53 = vadd.f32 %v4375_v57, %v2212_v8 }
 0x2fa   : > { %v2268_v22 = vmax.f32 %v2236_v23, 0.0  ;;  %v2284_v39 = vmax.f32 %v2252_v28, 0.0 }
 0x2fb   : > { %v2267_v7 = vmax.f32 %v2235_v61, 0.0  ;;  %v2283_v38 = vmax.f32 %v2251_v53, 0.0 }
 0x2fc   : > { %2300 = vst [vmem:[%s4391_s24 + $0x48] sm:$0xff] %v2268_v22  ;;  %2316 = vst [vmem:[%s4391_s24 + $0xc8] sm:$0xff] %v2284_v39 }
 0x2fd   : > { %2299 = vst [vmem:[%s4391_s24 + $0x40] sm:$0xff] %v2267_v7  ;;  %2315 = vst [vmem:[%s4391_s24 + $0xc0] sm:$0xff] %v2283_v38 }
 0x31d   : > { %v2774_v27 = vpop.f32.mrb[10].mxu0  ;;  %v2798_v62 = vpop.f32.mrb[10].mxu1 }
 0x31e   : > { %v2199_v18 = vmul.f32 %v2774_v27, %v4370_v60  ;;  %v2215_v44 = vmul.f32 %v2798_v62, %v4370_v60  ;;  %v2072_v34 = vpop.f32.mrb[11].mxu0  ;;  %v2152_v48 = vpop.f32.mrb[11].mxu1 }
 0x31f   : > { %v2198_v21 = vmul.f32 %v4370_v60, %v2072_v34  ;;  %v2214_v37 = vmul.f32 %v4370_v60, %v2152_v48 }
 0x320   : > { %v2238_v26 = vadd.f32 %v4375_v57, %v2199_v18  ;;  %v2254_v12 = vadd.f32 %v4375_v57, %v2215_v44 }
 0x321   : > { %v2237_v4 = vadd.f32 %v4375_v57, %v2198_v21  ;;  %v2253_v5 = vadd.f32 %v4375_v57, %v2214_v37 }
 0x322   : > { %v2270_v58 = vmax.f32 %v2238_v26, 0.0  ;;  %v2286_v52 = vmax.f32 %v2254_v12, 0.0 }
 0x323   : > { %v2269_v63 = vmax.f32 %v2237_v4, 0.0  ;;  %v2285_v54 = vmax.f32 %v2253_v5, 0.0 }
 0x324   : > { %2302 = vst [vmem:[%s4391_s24 + $0x58] sm:$0xff] %v2270_v58  ;;  %2318 = vst [vmem:[%s4391_s24 + $0xd8] sm:$0xff] %v2286_v52 }
 0x325   : > { %2301 = vst [vmem:[%s4391_s24 + $0x50] sm:$0xff] %v2269_v63  ;;  %2317 = vst [vmem:[%s4391_s24 + $0xd0] sm:$0xff] %v2285_v54 }
 0x345   : > { %v2777_v43 = vpop.f32.mrb[12].mxu0  ;;  %v2801_v2 = vpop.f32.mrb[12].mxu1 }
 0x346   : > { %v2201_v51 = vmul.f32 %v2777_v43, %v4370_v60  ;;  %v2217_v36 = vmul.f32 %v2801_v2, %v4370_v60  ;;  %v2082_v45 = vpop.f32.mrb[13].mxu0  ;;  %v2162_v9 = vpop.f32.mrb[13].mxu1 }
 0x347   : > { %v2200_v49 = vmul.f32 %v4370_v60, %v2082_v45  ;;  %v2216_v30 = vmul.f32 %v4370_v60, %v2162_v9 }
 0x348   : > { %v2240_v6 = vadd.f32 %v4375_v57, %v2201_v51  ;;  %v2256_v20 = vadd.f32 %v4375_v57, %v2217_v36 }
 0x349   : > { %v2239_v46 = vadd.f32 %v4375_v57, %v2200_v49  ;;  %v2255_v15 = vadd.f32 %v4375_v57, %v2216_v30 }
 0x34a   : > { %v2272_v40 = vmax.f32 %v2240_v6, 0.0  ;;  %v2288_v50 = vmax.f32 %v2256_v20, 0.0 }
 0x34b   : > { %v2271_v19 = vmax.f32 %v2239_v46, 0.0  ;;  %v2287_v55 = vmax.f32 %v2255_v15, 0.0 }
 0x34c   : > { %2304 = vst [vmem:[%s4391_s24 + $0x68] sm:$0xff] %v2272_v40  ;;  %2320 = vst [vmem:[%s4391_s24 + $0xe8] sm:$0xff] %v2288_v50 }
 0x34d   : > { %2303 = vst [vmem:[%s4391_s24 + $0x60] sm:$0xff] %v2271_v19  ;;  %2319 = vst [vmem:[%s4391_s24 + $0xe0] sm:$0xff] %v2287_v55 }
 0x361   : > { %v2780_v10 = vpop.f32.mrb[14].mxu0  ;;  %v2804_v17 = vpop.f32.mrb[14].mxu1 }
 0x362   : > { %v2203_v42 = vmul.f32 %v2780_v10, %v4370_v60  ;;  %v2219_v25 = vmul.f32 %v2804_v17, %v4370_v60  ;;  %v2092_v1 = vpop.f32.mrb[15].mxu0  ;;  %v2172_v3 = vpop.f32.mrb[15].mxu1 }
 0x363   : > { %v2202_v33 = vmul.f32 %v4370_v60, %v2092_v1  ;;  %v2218_v35 = vmul.f32 %v4370_v60, %v2172_v3 }
 0x364   : > { %v2242_v0 = vadd.f32 %v4375_v57, %v2203_v42  ;;  %v2258_v32 = vadd.f32 %v4375_v57, %v2219_v25 }
 0x365   : > { %v2241_v59 = vadd.f32 %v4375_v57, %v2202_v33  ;;  %v2257_v29 = vadd.f32 %v4375_v57, %v2218_v35 }
 0x366   : > { %v2274_v13 = vmax.f32 %v2242_v0, 0.0  ;;  %v2290_v24 = vmax.f32 %v2258_v32, 0.0 }
 0x367   : > { %v2273_v60 = vmax.f32 %v2241_v59, 0.0  ;;  %v2289_v31 = vmax.f32 %v2257_v29, 0.0 }
 0x368   : > { %2306 = vst [vmem:[%s4391_s24 + $0x78] sm:$0xff] %v2274_v13  ;;  %2322 = vst [vmem:[%s4391_s24 + $0xf8] sm:$0xff] %v2290_v24 }
 0x369   : > { %2305 = vst [vmem:[%s4391_s24 + $0x70] sm:$0xff] %v2273_v60  ;;  %2321 = vst [vmem:[%s4391_s24 + $0xf0] sm:$0xff] %v2289_v31 }
 0x36a   : > { %2897 = shalt.err (!%p2894_p5)
}
 0x36b   : > { %s2898_s7 = scalar_lea.hbm %s4544_s6, 4096  ;;  %s2902_s21 = scalar_lea.hbm %s4605_s4, 8192 }
 0x36c   : > { %p2899_p6 = scmp.ne.s32.totalorder %s4544_s6, %s2898_s7  ;;  %p2903_p10 = scmp.lt.u32.totalorder %s4544_s6, %s4605_s4 }
 0x36d   : > { %p2904_p11 = scmp.lt.u32.totalorder %s2902_s21, %s2898_s7  ;;  %p2906_p13 = scmp.lt.u32.totalorder %s2898_s7, %s4544_s6 }
 0x36e   : > { %p2900_p7 = pnand %p2899_p6, %p3039_p4 }
 0x36f   : > { %p2905_p12 = por %p2904_p11, %p2903_p10 }
 0x370   : > { %p2901_p9 = pneg %p2900_p7 }
 0x371   : > { %p2907_p0 = por %p2906_p13, %p2905_p12 }
 0x373   : > { %p2908_p1 = pnand %p2907_p0, %p2901_p9 }
 0x375   : > { %2911 = shalt.err (!%p2908_p1)
}
 0x376   : > { %s2973_s26 = smov 128  }
 0x377   : > { %2820 = dma.vmem_to_hbm [thread:$0]  (%p3039_p4), %s4546_s29, 4096, %s4544_s6, %s4554_s18, %s2973_s26, %s2973_s26, %s2965_s9  }
 0x378 PF: > { %p2826_p2 = scmp.ge.s32.totalorder %s2962_s20, 2  ;;  %s2356_s30 = sand.u32 1, %s2942_s15  }
 0x379   : > { %s2357_s5 = scalar_lea.sflag [#allocation3], %s2356_s30 }
 0x37a   : > { %p2823_p3 = pnand %p2826_p2, %p3046_p8 }
 0x37c   : > { %2937 = dma.done.wait (!%p2823_p3), %s2357_s5, 4096  }
 0x37d   : > { %2939 = vsyncadd (!%p2823_p3), %s2357_s5, 4294963200  ;;  %s17_s20 = sadd.s32 1, %s2962_s20   ;;  %s4733_s15 = smov %s2946_s16 }
 0x37e   : > { %p14_p5 = scmp.ge.s32.totalorder %s17_s20, 4   ;;  %s4734_s16 = smov %s2950_s17 }
 0x37f   : > { %s4735_s17 = smov %s3052_s28  ;;  %s4736_s18 = smov %s2958_s19 }
 0x380   : > { %s4737_s19 = smov %s4739_s23  ;;  %16 = sbr.rel (!%p14_p5) target bundleno = 4 (0x4), region = 83 }
 0x387   :  { %2362 = vsyncpa [#allocation3], 1 }
 0x388   :  { %2364 = vsyncpa [#allocation3 + $0x1], 1 }

</bundles_post_ra>
